<compile_context>
chip_gen: v5e
topology: v5e:2x2
jax: 0.10.0
libtpu: 0.0.40
codegen_flags: <defaults>
</compile_context>

<pallas_src>
import functools
import math

import jax
import jax.numpy as jnp
from jax import lax
from jax.experimental import pallas as pl
from jax.experimental.pallas import tpu as pltpu

_CONST2 = lambda b: (0, 0)  # index map for 2-D params kept resident across the grid


# ---------------------------------------------------------------------------
# Hardware queries / heuristics
# ---------------------------------------------------------------------------

def _tpu_generation():
    try:
        kind = jax.devices()[0].device_kind.lower()
    except Exception:
        return 6
    if "v7" in kind or "7x" in kind:
        return 7
    if "v6" in kind:
        return 6
    if "v5" in kind:
        return 5
    if "v4" in kind or "v3" in kind or "v2" in kind:
        return 5
    return 6


def _phys_vmem_bytes(gen):
    try:
        return int(pltpu.get_tpu_info().vmem_capacity_bytes)
    except Exception:
        return (64 << 20) if gen >= 7 else (128 << 20)


def _pick_block_b(batch, seq, d_ff, *, target_rows, min_grid_steps=1):
    """Batches per grid step: target MXU-width matmul rows, bounded ReLU tile,
    and (v7x) at least `min_grid_steps` grid steps so both TCs get work."""
    cap_rows = max(seq, (4 << 20) // (4 * d_ff))       # (rows, d_ff) f32 <= ~4 MiB
    want = max(1, min(target_rows, cap_rows) // seq)
    want = max(1, min(want, batch))
    if min_grid_steps > 1 and batch >= min_grid_steps:
        want = max(1, min(want, batch // min_grid_steps))
    while batch % want:                                # need an integer grid
        want -= 1
    return want


def _derive_vmem_limit(row_blk, d_model, d_ff, mm_bytes, phys_bytes, weight_bufs):
    """Shape-derived VMEM budget, capped at 3/4 of physical VMEM (48 MiB on v7x)."""
    w_bytes = (4 * d_model * d_model + 2 * d_model * d_ff) * mm_bytes * weight_bufs
    w_bytes += (10 * d_model + d_ff) * 4 * weight_bufs  # biases + norm params (f32)
    w_bytes += d_model * d_model * 4                    # block-diag scale constant
    act = row_blk * d_model * 4
    per_step = 4 * act                                  # double-buffered x-in + out
    per_step += row_blk * d_ff * 4                      # ReLU intermediate
    per_step += 12 * act                                # q/k/v/ctx/attn/x1/ff + casts
    per_step += d_model * d_model * 8                   # K^T V blocks (slack)
    derived = w_bytes + 2 * per_step
    cap = (3 * phys_bytes) // 4
    return int(min(max(derived, 32 << 20), cap))


def _wspec(shape, single_buffer):
    """Constant-index-map spec for a param kept VMEM-resident across the grid."""
    if single_buffer:
        try:
            return pl.BlockSpec(shape, _CONST2, pipeline_mode=pl.Buffered(1))
        except TypeError:      # older jax without BlockSpec(pipeline_mode=...)
            pass
    return pl.BlockSpec(shape, _CONST2)


# ---------------------------------------------------------------------------
# Kernels
# ---------------------------------------------------------------------------

def norm_kernel(x_ref, w_ref, b_ref, out_ref, *, eps, unbiased, eps_inside):
    """Row norm (only used for a 0-layer stack; otherwise fused into the layers)."""
    x = x_ref[...]                                      # (rows, D) f32
    d = x.shape[-1]
    mean = jnp.mean(x, axis=-1, keepdims=True)
    cent = x - mean
    denom = (d - 1) if unbiased else d
    var = jnp.sum(cent * cent, axis=-1, keepdims=True) * jnp.float32(1.0 / denom)
    if eps_inside:   # nn.LayerNorm: 1 / sqrt(var + eps)
        inv = lax.rsqrt(var + jnp.float32(eps))
    else:            # custom Norm: 1 / (std + eps)
        inv = pl.reciprocal(jnp.sqrt(var) + jnp.float32(eps), approx=True)
    out_ref[...] = (w_ref[...] * (cent * inv) + b_ref[...]).astype(out_ref.dtype)


def encoder_layer_kernel(x_ref, keep_ref, *rest, seq, d_k, heads, eps, eps_ln,
                         fuse_pre_ln, fuse_post_norm, attn_per_head):
    # ---- unpack refs: x, keep, [bd], [ln_w, ln_b], 16 weights, [norm_a, norm_b], out
    refs = list(rest)
    out_ref = refs.pop()
    it = iter(refs)
    bd_ref = None if attn_per_head else next(it)
    lnw_ref = lnb_ref = None
    if fuse_pre_ln:
        lnw_ref, lnb_ref = next(it), next(it)
    (wq_ref, bq_ref, wk_ref, bk_ref, wv_ref, bv_ref, wo_ref, bo_ref,
     w1_ref, b1_ref, w2_ref, b2_ref, a1_ref, g1_ref, a2_ref, g2_ref) = \
        tuple(next(it) for _ in range(16))
    na_ref = nb_ref = None
    if fuse_post_norm:
        na_ref, nb_ref = next(it), next(it)

    rows, d_model = x_ref.shape                         # rows = block_b * seq
    bb = rows // seq
    mm_dtype = wq_ref.dtype                             # bf16 (default) or f32

    x = x_ref[...]                                      # f32 (rows, D)

    if fuse_pre_ln:                                     # nn.LayerNorm prologue (1e-5)
        mean = jnp.mean(x, axis=-1, keepdims=True)
        cent = x - mean
        var = jnp.mean(cent * cent, axis=-1, keepdims=True)
        x = lnw_ref[...] * (cent * lax.rsqrt(var + jnp.float32(eps_ln))) + lnb_ref[...]

    def linear(v_cast, w_ref_, b_ref_):                 # bf16 operands, f32 accumulate
        return jnp.dot(v_cast, w_ref_[...],
                       preferred_element_type=jnp.float32) + b_ref_[...]

    # ---- QKV projections (one hoisted cast of x, reused 3x) ----
    xb = x.astype(mm_dtype)
    q = linear(xb, wq_ref, bq_ref)
    k = linear(xb, wk_ref, bk_ref)
    v = linear(xb, wv_ref, bv_ref)

    v3 = v.reshape(bb, seq, d_model)                    # f32: used for the masked rows
    qb = q.reshape(bb, seq, d_model).astype(mm_dtype)
    kb = k.reshape(bb, seq, d_model).astype(mm_dtype)
    vb = v3.astype(mm_dtype)

    # No-softmax quirk: out = (Q K^T / sqrt(d_k)) V == Q (K^T V) / sqrt(d_k).
    if attn_per_head:
        # Per-head batched dots: no MXU FLOPs wasted on cross-head blocks (D > MXU width).
        inv_sqrt = jnp.float32(1.0 / math.sqrt(d_k))
        parts = []
        for hh in range(heads):
            sl = slice(hh * d_k, (hh + 1) * d_k)
            kvh = lax.dot_general(kb[:, :, sl], vb[:, :, sl],
                                  (((1,), (1,)), ((0,), (0,))),
                                  preferred_element_type=jnp.float32)  # (bb, dk, dk)
            kvh = (kvh * inv_sqrt).astype(mm_dtype)
            parts.append(lax.dot_general(qb[:, :, sl], kvh,
                                         (((2,), (1,)), ((0,), (0,))),
                                         preferred_element_type=jnp.float32))
        ctx = jnp.concatenate(parts, axis=-1)           # (bb, S, D) f32
    else:
        # Block-diagonal (D x D) scale with 1/sqrt(d_k) folded in, precomputed host-side.
        kv = lax.dot_general(kb, vb, (((1,), (1,)), ((0,), (0,))),
                             preferred_element_type=jnp.float32)       # (bb, D, D)
        kv = (kv * bd_ref[...]).astype(mm_dtype)
        ctx = lax.dot_general(qb, kv, (((2,), (1,)), ((0,), (0,))),
                              preferred_element_type=jnp.float32)      # (bb, S, D)

    # Masked query rows: scores row == -1e9  =>  output row == -1e9 * sum_s V[s,:]
    keep = keep_ref[...]                                               # (bb, S, 1) f32
    masked_row = jnp.float32(-1.0e9) * jnp.sum(v3, axis=1, keepdims=True)  # (bb, 1, D)
    attn_ctx = jnp.where(keep > 0, ctx, masked_row)     # implicit broadcast to (bb,S,D)

    attn = linear(attn_ctx.reshape(rows, d_model).astype(mm_dtype), wo_ref, bo_ref)

    def custom_norm(val, a_ref_, g_ref_):
        mean = jnp.mean(val, axis=-1, keepdims=True)
        cent = val - mean
        # torch.std default: unbiased (divide by D-1); eps added to the std.
        var = jnp.sum(cent * cent, axis=-1, keepdims=True) * \
            jnp.float32(1.0 / (d_model - 1))
        inv = pl.reciprocal(jnp.sqrt(var) + jnp.float32(eps), approx=True)
        return a_ref_[...] * (cent * inv) + g_ref_[...]

    x1 = custom_norm(x + attn, a1_ref, g1_ref)                         # residual + Norm1

    # FeedForward: Linear -> ReLU -> Linear (f32 elementwise, MXU matmuls)
    ffh = jnp.maximum(linear(x1.astype(mm_dtype), w1_ref, b1_ref), jnp.float32(0.0))
    ff = linear(ffh.astype(mm_dtype), w2_ref, b2_ref)

    y = custom_norm(x1 + ff, a2_ref, g2_ref)                           # residual + Norm2

    if fuse_post_norm:                                  # final TransformerEmbedding.norm
        y = custom_norm(y, na_ref, nb_ref)

    out_ref[...] = y.astype(out_ref.dtype)


# ---------------------------------------------------------------------------
# pallas_call wrappers
# ---------------------------------------------------------------------------

def _norm_call(x2d, w, b, *, row_blk, eps, unbiased, eps_inside):
    rows, d_model = x2d.shape
    kernel = functools.partial(norm_kernel, eps=eps, unbiased=unbiased,
                               eps_inside=eps_inside)
    return pl.pallas_call(
        kernel,
        out_shape=jax.ShapeDtypeStruct((rows, d_model), jnp.float32),
        grid=(rows // row_blk,),
        in_specs=[pl.BlockSpec((row_blk, d_model), lambda i: (i, 0)),
                  pl.BlockSpec(w.shape, _CONST2),
                  pl.BlockSpec(b.shape, _CONST2)],
        out_specs=pl.BlockSpec((row_blk, d_model), lambda i: (i, 0)),
        compiler_params=pltpu.CompilerParams(dimension_semantics=("parallel",)),
    )(x2d, w, b)


def _encoder_layer_call(x2d, keep, lp, params, *, seq, heads, block_b, mm_dtype,
                        vmem_limit, attn_per_head, fuse_pre_ln, fuse_post_norm,
                        single_buf_weights):
    rows, d_model = x2d.shape
    batch = rows // seq
    d_k = d_model // heads
    row_blk = block_b * seq

    def cw(w):  # bf16 weights on the wire halve the weight DMA; f32 only if requested
        return w if mm_dtype == jnp.float32 else w.astype(mm_dtype)

    inputs = [x2d, keep]
    in_specs = [pl.BlockSpec((row_blk, d_model), lambda b: (b, 0)),
                pl.BlockSpec((block_b, seq, 1), lambda b: (b, 0, 0))]

    if not attn_per_head:
        idx = jnp.arange(d_model, dtype=jnp.int32) // d_k
        bd = (idx[:, None] == idx[None, :]).astype(jnp.float32) * \
            jnp.float32(1.0 / math.sqrt(d_k))           # head mask with 1/sqrt(d_k) folded
        inputs.append(bd)
        in_specs.append(_wspec((d_model, d_model), single_buf_weights))
    if fuse_pre_ln:
        inputs += [params["ln_w"], params["ln_b"]]
        in_specs += [_wspec(params["ln_w"].shape, single_buf_weights),
                     _wspec(params["ln_b"].shape, single_buf_weights)]

    weights = (cw(lp["wq"]), lp["bq"], cw(lp["wk"]), lp["bk"],
               cw(lp["wv"]), lp["bv"], cw(lp["wo"]), lp["bo"],
               cw(lp["w1"]), lp["b1"], cw(lp["w2"]), lp["b2"],
               lp["a1"], lp["g1"], lp["a2"], lp["g2"])
    inputs += list(weights)
    in_specs += [_wspec(w.shape, single_buf_weights) for w in weights]

    if fuse_post_norm:
        inputs += [params["norm_a"], params["norm_b"]]
        in_specs += [_wspec(params["norm_a"].shape, single_buf_weights),
                     _wspec(params["norm_b"].shape, single_buf_weights)]

    kernel = functools.partial(
        encoder_layer_kernel, seq=seq, d_k=d_k, heads=heads, eps=1e-6, eps_ln=1e-5,
        fuse_pre_ln=fuse_pre_ln, fuse_post_norm=fuse_post_norm,
        attn_per_head=attn_per_head)

    return pl.pallas_call(
        kernel,
        out_shape=jax.ShapeDtypeStruct((rows, d_model), jnp.float32),
        grid=(batch // block_b,),
        in_specs=in_specs,
        out_specs=pl.BlockSpec((row_blk, d_model), lambda b: (b, 0)),
        compiler_params=pltpu.CompilerParams(
            dimension_semantics=("parallel",),
            vmem_limit_bytes=vmem_limit),
    )(*inputs)


def sinusoidal_pos_emb(seq_len, d_model):
    pos = jnp.arange(seq_len, dtype=jnp.float32)
    inv_freq = 1.0 / (10000.0 ** (jnp.arange(0, d_model, 2, dtype=jnp.float32)
                                  / d_model))
    sinusoid = jnp.outer(pos, inv_freq)                              # (S, D/2)
    return jnp.concatenate([jnp.sin(sinusoid), jnp.cos(sinusoid)], axis=-1)


def transformer_embedding(input_ids, mask, params, *, heads,
                          mm_dtype=jnp.bfloat16, attn_impl="auto"):
    """input_ids: (B, S) int32; mask: (B, S) int32 (0 => masked query row).

    mm_dtype: matmul-operand dtype (bf16 default on all generations, f32 accumulate).
    attn_impl: "auto" | "blockdiag" | "perhead".
    """
    B, S = input_ids.shape
    emb = params["emb"]
    D = emb.shape[1]
    n_layers = len(params["layers"])
    d_ff = params["layers"][0]["w1"].shape[1] if n_layers else 4 * D
    assert D % heads == 0 and D % 2 == 0
    assert S % 8 == 0, "sequence length must be a multiple of 8 (TPU sublane tiling)"

    gen = _tpu_generation()
    if attn_impl == "auto":
        attn_per_head = D > (128 if gen <= 5 else 256)   # above MXU tile width
    else:
        attn_per_head = (attn_impl == "perhead")

    # TODO(synk): the nn.Embedding gather stays in XLA (jnp.take); an in-kernel
    # version needs a scalar-prefetch (PrefetchScalarGridSpec + pl.Element) DMA gather.
    words = jnp.take(emb, input_ids, axis=0)                         # (B, S, D)
    x = (words + sinusoidal_pos_emb(S, D)[None]).reshape(B * S, D)

    keep = mask.astype(jnp.float32).reshape(B, S, 1)                 # 1 = keep row

    target_rows = 128 if gen <= 5 else 256               # MXU width 128 (v5e) / 256
    min_steps = 2 if gen >= 7 else 1                      # keep both v7x TCs busy
    block_b = _pick_block_b(B, S, d_ff, target_rows=target_rows,
                            min_grid_steps=min_steps)
    mm_bytes = 4 if mm_dtype == jnp.float32 else 2
    weight_bytes = (4 * D * D + 2 * D * d_ff) * mm_bytes
    single_buf_weights = weight_bytes > (8 << 20)         # single-buffer big weight sets
    vmem_limit = _derive_vmem_limit(block_b * S, D, d_ff, mm_bytes,
                                    _phys_vmem_bytes(gen),
                                    weight_bufs=1 if single_buf_weights else 2)

    if n_layers == 0:
        # Degenerate stack: LayerNorm then final Norm as standalone blocked launches.
        x = _norm_call(x, params["ln_w"], params["ln_b"], row_blk=block_b * S,
                       eps=1e-5, unbiased=False, eps_inside=True)
        x = _norm_call(x, params["norm_a"], params["norm_b"], row_blk=block_b * S,
                       eps=1e-6, unbiased=True, eps_inside=False)
        return x.reshape(B, S, D)

    for li, lp in enumerate(params["layers"]):
        x = _encoder_layer_call(
            x, keep, lp, params, seq=S, heads=heads, block_b=block_b,
            mm_dtype=mm_dtype, vmem_limit=vmem_limit, attn_per_head=attn_per_head,
            fuse_pre_ln=(li == 0),                 # embedding LayerNorm prologue
            fuse_post_norm=(li == n_layers - 1),   # final custom Norm epilogue
            single_buf_weights=single_buf_weights)
    return x.reshape(B, S, D)


# ---------------------------------------------------------------------------
# Parameters & pure-JAX reference (mirrors the PyTorch forward)
# ---------------------------------------------------------------------------

def init_params(key, vocab, d_model, d_ff, layers):
    """Deterministic synthetic params; nn.Linear weights stored as (in, out)."""
    keys = iter(jax.random.split(key, 5 + 16 * layers))

    def rnd(shape, scale=0.05):
        return (scale * jax.random.normal(next(keys), shape)).astype(jnp.float32)

    params = {
        "emb": rnd((vocab, d_model), 0.5).at[0].set(0.0),   # padding_idx=0 row zeroed
        # Norm params are perturbed from the PyTorch ones/zeros init to make the
        # numerical check stronger (semantics are identical).
        "ln_w": 1.0 + rnd((1, d_model), 0.1), "ln_b": rnd((1, d_model), 0.1),
        "norm_a": 1.0 + rnd((1, d_model), 0.1), "norm_b": rnd((1, d_model), 0.1),
        "layers": [],
    }
    for _ in range(layers):
        params["layers"].append({
            "wq": rnd((d_model, d_model)), "bq": rnd((1, d_model)),
            "wk": rnd((d_model, d_model)), "bk": rnd((1, d_model)),
            "wv": rnd((d_model, d_model)), "bv": rnd((1, d_model)),
            "wo": rnd((d_model, d_model)), "bo": rnd((1, d_model)),
            "w1": rnd((d_model, d_ff)),    "b1": rnd((1, d_ff)),
            "w2": rnd((d_ff, d_model)),    "b2": rnd((1, d_model)),
            "a1": 1.0 + rnd((1, d_model), 0.1), "g1": rnd((1, d_model), 0.1),
            "a2": 1.0 + rnd((1, d_model), 0.1), "g2": rnd((1, d_model), 0.1),
        })
    return params


def _ref_norm(x, w, b, eps, unbiased, eps_inside):
    d = x.shape[-1]
    mean = x.mean(-1, keepdims=True)
    c = x - mean
    var = (c * c).sum(-1, keepdims=True) / ((d - 1) if unbiased else d)
    if eps_inside:
        return w[0] * c / jnp.sqrt(var + eps) + b[0]
    return w[0] * c / (jnp.sqrt(var) + eps) + b[0]


def _ref_encoder_layer(x, mask, lp, heads):
    B, S, D = x.shape
    d_k = D // heads

    def lin(v, w, b):
        return v @ w + b[0]

    q = lin(x, lp["wq"], lp["bq"]).reshape(B, S, heads, d_k).transpose(0, 2, 1, 3)
    k = lin(x, lp["wk"], lp["bk"]).reshape(B, S, heads, d_k).transpose(0, 2, 1, 3)
    v = lin(x, lp["wv"], lp["bv"]).reshape(B, S, heads, d_k).transpose(0, 2, 1, 3)
    scores = jnp.einsum("bhqd,bhkd->bhqk", q, k) / math.sqrt(d_k)
    scores = jnp.where(mask[:, None, :, None] == 0, -1.0e9, scores)
    out = jnp.einsum("bhqk,bhkd->bhqd", scores, v)      # raw scores @ V (ref quirk)
    concat = out.transpose(0, 2, 1, 3).reshape(B, S, D)
    attn = lin(concat, lp["wo"], lp["bo"])
    x1 = _ref_norm(x + attn, lp["a1"], lp["g1"], 1e-6, True, False)
    ff = lin(jnp.maximum(lin(x1, lp["w1"], lp["b1"]), 0.0), lp["w2"], lp["b2"])
    return _ref_norm(x1 + ff, lp["a2"], lp["g2"], 1e-6, True, False)


def transformer_embedding_reference(input_ids, mask, params, *, heads):
    B, S = input_ids.shape
    D = params["emb"].shape[1]
    x = params["emb"][input_ids] + sinusoidal_pos_emb(S, D)[None]
    x = _ref_norm(x, params["ln_w"], params["ln_b"], 1e-5, False, True)
    for lp in params["layers"]:
        x = _ref_encoder_layer(x, mask, lp, heads)
    return _ref_norm(x, params["norm_a"], params["norm_b"], 1e-6, True, False)


# ---------------------------------------------------------------------------

if __name__ == "__main__":
    B, S, D, HEADS, LAYERS = 2, 8, 32, 4, 2
    VOCAB, D_FF = 64, 2048            # FeedForward keeps the PyTorch default d_ff

    key = jax.random.PRNGKey(0)
    k_ids, k_par = jax.random.split(key)
    input_ids = jax.random.randint(k_ids, (B, S), 1, VOCAB, dtype=jnp.int32)
    input_ids = input_ids.at[0, -2:].set(0)              # padding tokens
    mask = (input_ids != 0).astype(jnp.int32)            # 0 => masked query row

    params = init_params(k_par, VOCAB, D, D_FF, LAYERS)
    ref = transformer_embedding_reference(input_ids, mask, params, heads=HEADS)

    # f32-matmul path: strict faithfulness check vs the PyTorch-equivalent reference.
    out_f32 = jax.block_until_ready(
        transformer_embedding(input_ids, mask, params, heads=HEADS,
                              mm_dtype=jnp.float32))
    assert out_f32.shape == (B, S, D)
    assert bool(jnp.all(jnp.isfinite(out_f32)))
    assert jnp.allclose(out_f32, ref, rtol=5e-2, atol=5e-2), (
        f"f32 path max abs diff {float(jnp.max(jnp.abs(out_f32 - ref)))}")

    # Default path (bf16 matmul operands, f32 accumulation): tolerance check.
    out_bf16 = jax.block_until_ready(
        transformer_embedding(input_ids, mask, params, heads=HEADS))
    assert out_bf16.shape == (B, S, D)
    assert bool(jnp.all(jnp.isfinite(out_bf16)))
    assert jnp.allclose(out_bf16, ref, rtol=2e-1, atol=2e-1), (
        f"bf16 path max abs diff {float(jnp.max(jnp.abs(out_bf16 - ref)))}")

    # Per-head attention path (auto-selected when d_model exceeds the MXU width):
    # exercised explicitly here with f32 matmuls for a tight structural check.
    out_ph = jax.block_until_ready(
        transformer_embedding(input_ids, mask, params, heads=HEADS,
                              mm_dtype=jnp.float32, attn_impl="perhead"))
    assert jnp.allclose(out_ph, ref, rtol=5e-2, atol=5e-2), (
        f"per-head path max abs diff {float(jnp.max(jnp.abs(out_ph - ref)))}")

    print("KERNEL_OK")
</pallas_src>

<mosaic_0001>
module attributes {stable_mosaic.version = 11 : i64} {
  func.func @encoder_layer_kernel(%arg0: i32, %arg1: memref<16x32xf32, #tpu.memory_space<vmem>>, %arg2: memref<2x8x1xf32, #tpu.memory_space<vmem>>, %arg3: memref<32x32xf32, #tpu.memory_space<vmem>>, %arg4: memref<1x32xf32, #tpu.memory_space<vmem>>, %arg5: memref<1x32xf32, #tpu.memory_space<vmem>>, %arg6: memref<32x32xf32, #tpu.memory_space<vmem>>, %arg7: memref<1x32xf32, #tpu.memory_space<vmem>>, %arg8: memref<32x32xf32, #tpu.memory_space<vmem>>, %arg9: memref<1x32xf32, #tpu.memory_space<vmem>>, %arg10: memref<32x32xf32, #tpu.memory_space<vmem>>, %arg11: memref<1x32xf32, #tpu.memory_space<vmem>>, %arg12: memref<32x32xf32, #tpu.memory_space<vmem>>, %arg13: memref<1x32xf32, #tpu.memory_space<vmem>>, %arg14: memref<32x2048xf32, #tpu.memory_space<vmem>>, %arg15: memref<1x2048xf32, #tpu.memory_space<vmem>>, %arg16: memref<2048x32xf32, #tpu.memory_space<vmem>>, %arg17: memref<1x32xf32, #tpu.memory_space<vmem>>, %arg18: memref<1x32xf32, #tpu.memory_space<vmem>>, %arg19: memref<1x32xf32, #tpu.memory_space<vmem>>, %arg20: memref<1x32xf32, #tpu.memory_space<vmem>>, %arg21: memref<1x32xf32, #tpu.memory_space<vmem>>, %arg22: memref<16x32xf32, #tpu.memory_space<vmem>>) attributes {dimension_semantics = [#tpu.dimension_semantics<parallel>], iteration_bounds = array<i64: 1>, scalar_prefetch = 0 : i64, scratch_operands = 0 : i64, tpu.core_type = #tpu.core_type<tc>, window_params = [{transform_indices = @transform_0, window_bounds = array<i64: 16, 32>}, {transform_indices = @transform_1, window_bounds = array<i64: 2, 8, 1>}, {pipeline_mode = #tpu.pipeline_mode<synchronous>, transform_indices = @transform_2, window_bounds = array<i64: 32, 32>}, {pipeline_mode = #tpu.pipeline_mode<synchronous>, transform_indices = @transform_3, window_bounds = array<i64: 1, 32>}, {pipeline_mode = #tpu.pipeline_mode<synchronous>, transform_indices = @transform_4, window_bounds = array<i64: 1, 32>}, {pipeline_mode = #tpu.pipeline_mode<synchronous>, transform_indices = @transform_5, window_bounds = array<i64: 32, 32>}, {pipeline_mode = #tpu.pipeline_mode<synchronous>, transform_indices = @transform_6, window_bounds = array<i64: 1, 32>}, {pipeline_mode = #tpu.pipeline_mode<synchronous>, transform_indices = @transform_7, window_bounds = array<i64: 32, 32>}, {pipeline_mode = #tpu.pipeline_mode<synchronous>, transform_indices = @transform_8, window_bounds = array<i64: 1, 32>}, {pipeline_mode = #tpu.pipeline_mode<synchronous>, transform_indices = @transform_9, window_bounds = array<i64: 32, 32>}, {pipeline_mode = #tpu.pipeline_mode<synchronous>, transform_indices = @transform_10, window_bounds = array<i64: 1, 32>}, {pipeline_mode = #tpu.pipeline_mode<synchronous>, transform_indices = @transform_11, window_bounds = array<i64: 32, 32>}, {pipeline_mode = #tpu.pipeline_mode<synchronous>, transform_indices = @transform_12, window_bounds = array<i64: 1, 32>}, {pipeline_mode = #tpu.pipeline_mode<synchronous>, transform_indices = @transform_13, window_bounds = array<i64: 32, 2048>}, {pipeline_mode = #tpu.pipeline_mode<synchronous>, transform_indices = @transform_14, window_bounds = array<i64: 1, 2048>}, {pipeline_mode = #tpu.pipeline_mode<synchronous>, transform_indices = @transform_15, window_bounds = array<i64: 2048, 32>}, {pipeline_mode = #tpu.pipeline_mode<synchronous>, transform_indices = @transform_16, window_bounds = array<i64: 1, 32>}, {pipeline_mode = #tpu.pipeline_mode<synchronous>, transform_indices = @transform_17, window_bounds = array<i64: 1, 32>}, {pipeline_mode = #tpu.pipeline_mode<synchronous>, transform_indices = @transform_18, window_bounds = array<i64: 1, 32>}, {pipeline_mode = #tpu.pipeline_mode<synchronous>, transform_indices = @transform_19, window_bounds = array<i64: 1, 32>}, {pipeline_mode = #tpu.pipeline_mode<synchronous>, transform_indices = @transform_20, window_bounds = array<i64: 1, 32>}, {transform_indices = @transform_21, window_bounds = array<i64: 16, 32>}]} {
    %c0 = arith.constant 0 : index
    %c0_0 = arith.constant 0 : index
    %0 = vector.load %arg1[%c0, %c0_0] : memref<16x32xf32, #tpu.memory_space<vmem>>, vector<16x32xf32>
    %cst = arith.constant dense<0.000000e+00> : vector<16xf32>
    %1 = vector.multi_reduction <add>, %0, %cst [1] : vector<16x32xf32> to vector<16xf32>
    %2 = vector.shape_cast %1 : vector<16xf32> to vector<16x1xf32>
    %cst_1 = arith.constant 3.200000e+01 : f32
    %3 = vector.broadcast %cst_1 : f32 to vector<16x1xf32>
    %4 = arith.divf %2, %3 : vector<16x1xf32>
    %5 = vector.broadcast %4 : vector<16x1xf32> to vector<16x32xf32>
    %6 = arith.subf %0, %5 : vector<16x32xf32>
    %7 = arith.mulf %6, %6 : vector<16x32xf32>
    %cst_2 = arith.constant dense<0.000000e+00> : vector<16xf32>
    %8 = vector.multi_reduction <add>, %7, %cst_2 [1] : vector<16x32xf32> to vector<16xf32>
    %9 = vector.shape_cast %8 : vector<16xf32> to vector<16x1xf32>
    %cst_3 = arith.constant 3.200000e+01 : f32
    %10 = vector.broadcast %cst_3 : f32 to vector<16x1xf32>
    %11 = arith.divf %9, %10 : vector<16x1xf32>
    %c0_4 = arith.constant 0 : index
    %c0_5 = arith.constant 0 : index
    %12 = vector.load %arg4[%c0_4, %c0_5] : memref<1x32xf32, #tpu.memory_space<vmem>>, vector<1x32xf32>
    %cst_6 = arith.constant 9.99999974E-6 : f32
    %13 = vector.broadcast %cst_6 : f32 to vector<16x1xf32>
    %14 = arith.addf %11, %13 : vector<16x1xf32>
    %15 = math.rsqrt %14 : vector<16x1xf32>
    %16 = vector.broadcast %15 : vector<16x1xf32> to vector<16x32xf32>
    %17 = arith.mulf %6, %16 : vector<16x32xf32>
    %18 = vector.broadcast %12 : vector<1x32xf32> to vector<16x32xf32>
    %19 = arith.mulf %18, %17 : vector<16x32xf32>
    %c0_7 = arith.constant 0 : index
    %c0_8 = arith.constant 0 : index
    %20 = vector.load %arg5[%c0_7, %c0_8] : memref<1x32xf32, #tpu.memory_space<vmem>>, vector<1x32xf32>
    %21 = vector.broadcast %20 : vector<1x32xf32> to vector<16x32xf32>
    %22 = arith.addf %19, %21 : vector<16x32xf32>
    %c0_9 = arith.constant 0 : index
    %c0_10 = arith.constant 0 : index
    %23 = vector.load %arg6[%c0_9, %c0_10] : memref<32x32xf32, #tpu.memory_space<vmem>>, vector<32x32xf32>
    %cst_11 = arith.constant dense<0.000000e+00> : vector<16x32xf32>
    %24 = tpu.matmul %22, %23, %cst_11 {dimension_numbers = #tpu.dot_dimension_numbers<[1], [0], [0], [1], [0, 0, 1, 1], [], []>} : vector<16x32xf32>, vector<32x32xf32>, vector<16x32xf32> -> vector<16x32xf32>
    %c0_12 = arith.constant 0 : index
    %c0_13 = arith.constant 0 : index
    %25 = vector.load %arg7[%c0_12, %c0_13] : memref<1x32xf32, #tpu.memory_space<vmem>>, vector<1x32xf32>
    %26 = vector.broadcast %25 : vector<1x32xf32> to vector<16x32xf32>
    %27 = arith.addf %24, %26 : vector<16x32xf32>
    %c0_14 = arith.constant 0 : index
    %c0_15 = arith.constant 0 : index
    %28 = vector.load %arg8[%c0_14, %c0_15] : memref<32x32xf32, #tpu.memory_space<vmem>>, vector<32x32xf32>
    %cst_16 = arith.constant dense<0.000000e+00> : vector<16x32xf32>
    %29 = tpu.matmul %22, %28, %cst_16 {dimension_numbers = #tpu.dot_dimension_numbers<[1], [0], [0], [1], [0, 0, 1, 1], [], []>} : vector<16x32xf32>, vector<32x32xf32>, vector<16x32xf32> -> vector<16x32xf32>
    %c0_17 = arith.constant 0 : index
    %c0_18 = arith.constant 0 : index
    %30 = vector.load %arg9[%c0_17, %c0_18] : memref<1x32xf32, #tpu.memory_space<vmem>>, vector<1x32xf32>
    %31 = vector.broadcast %30 : vector<1x32xf32> to vector<16x32xf32>
    %32 = arith.addf %29, %31 : vector<16x32xf32>
    %c0_19 = arith.constant 0 : index
    %c0_20 = arith.constant 0 : index
    %33 = vector.load %arg10[%c0_19, %c0_20] : memref<32x32xf32, #tpu.memory_space<vmem>>, vector<32x32xf32>
    %cst_21 = arith.constant dense<0.000000e+00> : vector<16x32xf32>
    %34 = tpu.matmul %22, %33, %cst_21 {dimension_numbers = #tpu.dot_dimension_numbers<[1], [0], [0], [1], [0, 0, 1, 1], [], []>} : vector<16x32xf32>, vector<32x32xf32>, vector<16x32xf32> -> vector<16x32xf32>
    %c0_22 = arith.constant 0 : index
    %c0_23 = arith.constant 0 : index
    %35 = vector.load %arg11[%c0_22, %c0_23] : memref<1x32xf32, #tpu.memory_space<vmem>>, vector<1x32xf32>
    %36 = vector.broadcast %35 : vector<1x32xf32> to vector<16x32xf32>
    %37 = arith.addf %34, %36 : vector<16x32xf32>
    %38 = vector.shape_cast %37 : vector<16x32xf32> to vector<2x8x32xf32>
    %39 = vector.shape_cast %27 : vector<16x32xf32> to vector<2x8x32xf32>
    %40 = vector.shape_cast %32 : vector<16x32xf32> to vector<2x8x32xf32>
    %cst_24 = arith.constant dense<0.000000e+00> : vector<2x32x32xf32>
    %41 = tpu.matmul %40, %38, %cst_24 {dimension_numbers = #tpu.dot_dimension_numbers<[1], [1], [2], [2], [0, 0, 0, 2, 1, 2], [0], [0]>} : vector<2x8x32xf32>, vector<2x8x32xf32>, vector<2x32x32xf32> -> vector<2x32x32xf32>
    %c0_25 = arith.constant 0 : index
    %c0_26 = arith.constant 0 : index
    %42 = vector.load %arg3[%c0_25, %c0_26] : memref<32x32xf32, #tpu.memory_space<vmem>>, vector<32x32xf32>
    %43 = vector.shape_cast %42 : vector<32x32xf32> to vector<1x32x32xf32>
    %44 = vector.broadcast %43 : vector<1x32x32xf32> to vector<2x32x32xf32>
    %45 = arith.mulf %41, %44 : vector<2x32x32xf32>
    %cst_27 = arith.constant dense<0.000000e+00> : vector<2x8x32xf32>
    %46 = tpu.matmul %39, %45, %cst_27 {dimension_numbers = #tpu.dot_dimension_numbers<[2], [1], [1], [2], [0, 0, 0, 1, 1, 2], [0], [0]>} : vector<2x8x32xf32>, vector<2x32x32xf32>, vector<2x8x32xf32> -> vector<2x8x32xf32>
    %c0_28 = arith.constant 0 : index
    %c0_29 = arith.constant 0 : index
    %c0_30 = arith.constant 0 : index
    %47 = vector.load %arg2[%c0_28, %c0_29, %c0_30] : memref<2x8x1xf32, #tpu.memory_space<vmem>>, vector<2x8x1xf32>
    %cst_31 = arith.constant dense<0.000000e+00> : vector<2x32xf32>
    %48 = vector.multi_reduction <add>, %38, %cst_31 [1] : vector<2x8x32xf32> to vector<2x32xf32>
    %49 = vector.shape_cast %48 : vector<2x32xf32> to vector<2x1x32xf32>
    %cst_32 = arith.constant -1.000000e+09 : f32
    %50 = vector.broadcast %cst_32 : f32 to vector<2x1x32xf32>
    %51 = arith.mulf %50, %49 : vector<2x1x32xf32>
    %cst_33 = arith.constant 0.000000e+00 : f32
    %52 = vector.broadcast %cst_33 : f32 to vector<2x8x1xf32>
    %53 = arith.cmpf ogt, %47, %52 : vector<2x8x1xf32>
    %54 = vector.shape_cast %53 : vector<2x8x1xi1> to vector<2x8x1xi1>
    %55 = vector.broadcast %54 : vector<2x8x1xi1> to vector<2x8x32xi1>
    %56 = vector.shape_cast %51 : vector<2x1x32xf32> to vector<2x1x32xf32>
    %57 = vector.broadcast %56 : vector<2x1x32xf32> to vector<2x8x32xf32>
    %58 = arith.select %55, %46, %57 : vector<2x8x32xi1>, vector<2x8x32xf32>
    %59 = vector.shape_cast %58 : vector<2x8x32xf32> to vector<16x32xf32>
    %c0_34 = arith.constant 0 : index
    %c0_35 = arith.constant 0 : index
    %60 = vector.load %arg12[%c0_34, %c0_35] : memref<32x32xf32, #tpu.memory_space<vmem>>, vector<32x32xf32>
    %cst_36 = arith.constant dense<0.000000e+00> : vector<16x32xf32>
    %61 = tpu.matmul %59, %60, %cst_36 {dimension_numbers = #tpu.dot_dimension_numbers<[1], [0], [0], [1], [0, 0, 1, 1], [], []>} : vector<16x32xf32>, vector<32x32xf32>, vector<16x32xf32> -> vector<16x32xf32>
    %c0_37 = arith.constant 0 : index
    %c0_38 = arith.constant 0 : index
    %62 = vector.load %arg13[%c0_37, %c0_38] : memref<1x32xf32, #tpu.memory_space<vmem>>, vector<1x32xf32>
    %63 = vector.broadcast %62 : vector<1x32xf32> to vector<16x32xf32>
    %64 = arith.addf %61, %63 : vector<16x32xf32>
    %65 = arith.addf %22, %64 : vector<16x32xf32>
    %cst_39 = arith.constant dense<0.000000e+00> : vector<16xf32>
    %66 = vector.multi_reduction <add>, %65, %cst_39 [1] : vector<16x32xf32> to vector<16xf32>
    %67 = vector.shape_cast %66 : vector<16xf32> to vector<16x1xf32>
    %cst_40 = arith.constant 3.200000e+01 : f32
    %68 = vector.broadcast %cst_40 : f32 to vector<16x1xf32>
    %69 = arith.divf %67, %68 : vector<16x1xf32>
    %70 = vector.broadcast %69 : vector<16x1xf32> to vector<16x32xf32>
    %71 = arith.subf %65, %70 : vector<16x32xf32>
    %72 = arith.mulf %71, %71 : vector<16x32xf32>
    %cst_41 = arith.constant dense<0.000000e+00> : vector<16xf32>
    %73 = vector.multi_reduction <add>, %72, %cst_41 [1] : vector<16x32xf32> to vector<16xf32>
    %74 = vector.shape_cast %73 : vector<16xf32> to vector<16x1xf32>
    %cst_42 = arith.constant 0.0322580636 : f32
    %75 = vector.broadcast %cst_42 : f32 to vector<16x1xf32>
    %76 = arith.mulf %74, %75 : vector<16x1xf32>
    %77 = math.sqrt %76 : vector<16x1xf32>
    %cst_43 = arith.constant 9.99999997E-7 : f32
    %78 = vector.broadcast %cst_43 : f32 to vector<16x1xf32>
    %79 = arith.addf %77, %78 : vector<16x1xf32>
    %80 = tpu.reciprocal %79 {approx = true} : vector<16x1xf32> -> vector<16x1xf32>
    %c0_44 = arith.constant 0 : index
    %c0_45 = arith.constant 0 : index
    %81 = vector.load %arg18[%c0_44, %c0_45] : memref<1x32xf32, #tpu.memory_space<vmem>>, vector<1x32xf32>
    %82 = vector.broadcast %80 : vector<16x1xf32> to vector<16x32xf32>
    %83 = arith.mulf %71, %82 : vector<16x32xf32>
    %84 = vector.broadcast %81 : vector<1x32xf32> to vector<16x32xf32>
    %85 = arith.mulf %84, %83 : vector<16x32xf32>
    %c0_46 = arith.constant 0 : index
    %c0_47 = arith.constant 0 : index
    %86 = vector.load %arg19[%c0_46, %c0_47] : memref<1x32xf32, #tpu.memory_space<vmem>>, vector<1x32xf32>
    %87 = vector.broadcast %86 : vector<1x32xf32> to vector<16x32xf32>
    %88 = arith.addf %85, %87 : vector<16x32xf32>
    %c0_48 = arith.constant 0 : index
    %c0_49 = arith.constant 0 : index
    %89 = vector.load %arg14[%c0_48, %c0_49] : memref<32x2048xf32, #tpu.memory_space<vmem>>, vector<32x2048xf32>
    %cst_50 = arith.constant dense<0.000000e+00> : vector<16x2048xf32>
    %90 = tpu.matmul %88, %89, %cst_50 {dimension_numbers = #tpu.dot_dimension_numbers<[1], [0], [0], [1], [0, 0, 1, 1], [], []>} : vector<16x32xf32>, vector<32x2048xf32>, vector<16x2048xf32> -> vector<16x2048xf32>
    %c0_51 = arith.constant 0 : index
    %c0_52 = arith.constant 0 : index
    %91 = vector.load %arg15[%c0_51, %c0_52] : memref<1x2048xf32, #tpu.memory_space<vmem>>, vector<1x2048xf32>
    %92 = vector.broadcast %91 : vector<1x2048xf32> to vector<16x2048xf32>
    %93 = arith.addf %90, %92 : vector<16x2048xf32>
    %cst_53 = arith.constant 0.000000e+00 : f32
    %94 = vector.broadcast %cst_53 : f32 to vector<16x2048xf32>
    %95 = arith.maximumf %93, %94 : vector<16x2048xf32>
    %c0_54 = arith.constant 0 : index
    %c0_55 = arith.constant 0 : index
    %96 = vector.load %arg16[%c0_54, %c0_55] : memref<2048x32xf32, #tpu.memory_space<vmem>>, vector<2048x32xf32>
    %cst_56 = arith.constant dense<0.000000e+00> : vector<16x32xf32>
    %97 = tpu.matmul %95, %96, %cst_56 {dimension_numbers = #tpu.dot_dimension_numbers<[1], [0], [0], [1], [0, 0, 1, 1], [], []>} : vector<16x2048xf32>, vector<2048x32xf32>, vector<16x32xf32> -> vector<16x32xf32>
    %c0_57 = arith.constant 0 : index
    %c0_58 = arith.constant 0 : index
    %98 = vector.load %arg17[%c0_57, %c0_58] : memref<1x32xf32, #tpu.memory_space<vmem>>, vector<1x32xf32>
    %99 = vector.broadcast %98 : vector<1x32xf32> to vector<16x32xf32>
    %100 = arith.addf %97, %99 : vector<16x32xf32>
    %101 = arith.addf %88, %100 : vector<16x32xf32>
    %cst_59 = arith.constant dense<0.000000e+00> : vector<16xf32>
    %102 = vector.multi_reduction <add>, %101, %cst_59 [1] : vector<16x32xf32> to vector<16xf32>
    %103 = vector.shape_cast %102 : vector<16xf32> to vector<16x1xf32>
    %cst_60 = arith.constant 3.200000e+01 : f32
    %104 = vector.broadcast %cst_60 : f32 to vector<16x1xf32>
    %105 = arith.divf %103, %104 : vector<16x1xf32>
    %106 = vector.broadcast %105 : vector<16x1xf32> to vector<16x32xf32>
    %107 = arith.subf %101, %106 : vector<16x32xf32>
    %108 = arith.mulf %107, %107 : vector<16x32xf32>
    %cst_61 = arith.constant dense<0.000000e+00> : vector<16xf32>
    %109 = vector.multi_reduction <add>, %108, %cst_61 [1] : vector<16x32xf32> to vector<16xf32>
    %110 = vector.shape_cast %109 : vector<16xf32> to vector<16x1xf32>
    %cst_62 = arith.constant 0.0322580636 : f32
    %111 = vector.broadcast %cst_62 : f32 to vector<16x1xf32>
    %112 = arith.mulf %110, %111 : vector<16x1xf32>
    %113 = math.sqrt %112 : vector<16x1xf32>
    %cst_63 = arith.constant 9.99999997E-7 : f32
    %114 = vector.broadcast %cst_63 : f32 to vector<16x1xf32>
    %115 = arith.addf %113, %114 : vector<16x1xf32>
    %116 = tpu.reciprocal %115 {approx = true} : vector<16x1xf32> -> vector<16x1xf32>
    %c0_64 = arith.constant 0 : index
    %c0_65 = arith.constant 0 : index
    %117 = vector.load %arg20[%c0_64, %c0_65] : memref<1x32xf32, #tpu.memory_space<vmem>>, vector<1x32xf32>
    %118 = vector.broadcast %116 : vector<16x1xf32> to vector<16x32xf32>
    %119 = arith.mulf %107, %118 : vector<16x32xf32>
    %120 = vector.broadcast %117 : vector<1x32xf32> to vector<16x32xf32>
    %121 = arith.mulf %120, %119 : vector<16x32xf32>
    %c0_66 = arith.constant 0 : index
    %c0_67 = arith.constant 0 : index
    %122 = vector.load %arg21[%c0_66, %c0_67] : memref<1x32xf32, #tpu.memory_space<vmem>>, vector<1x32xf32>
    %123 = vector.broadcast %122 : vector<1x32xf32> to vector<16x32xf32>
    %124 = arith.addf %121, %123 : vector<16x32xf32>
    %c0_68 = arith.constant 0 : index
    %c0_69 = arith.constant 0 : index
    %125 = vector.load %arg22[%c0_68, %c0_69] : memref<16x32xf32, #tpu.memory_space<vmem>>, vector<16x32xf32>
    tpu.vector_store %arg22[%c0_68, %c0_69], %124 {strides = array<i32>} : memref<16x32xf32, #tpu.memory_space<vmem>>, vector<16x32xf32>,
    return
  }
  func.func @transform_0(%arg0: i32) -> (i32, i32) {
    %c0_i32 = arith.constant 0 : i32
    %c0_i32_0 = arith.constant 0 : i32
    return %arg0, %c0_i32 : i32, i32
  }
  func.func @transform_1(%arg0: i32) -> (i32, i32, i32) {
    %c0_i32 = arith.constant 0 : i32
    %c0_i32_0 = arith.constant 0 : i32
    %c0_i32_1 = arith.constant 0 : i32
    return %arg0, %c0_i32, %c0_i32_0 : i32, i32, i32
  }
  func.func @transform_2(%arg0: i32) -> (i32, i32) {
    %c0_i32 = arith.constant 0 : i32
    %c0_i32_0 = arith.constant 0 : i32
    %c0_i32_1 = arith.constant 0 : i32
    return %c0_i32, %c0_i32_0 : i32, i32
  }
  func.func @transform_3(%arg0: i32) -> (i32, i32) {
    %c0_i32 = arith.constant 0 : i32
    %c0_i32_0 = arith.constant 0 : i32
    %c0_i32_1 = arith.constant 0 : i32
    return %c0_i32, %c0_i32_0 : i32, i32
  }
  func.func @transform_4(%arg0: i32) -> (i32, i32) {
    %c0_i32 = arith.constant 0 : i32
    %c0_i32_0 = arith.constant 0 : i32
    %c0_i32_1 = arith.constant 0 : i32
    return %c0_i32, %c0_i32_0 : i32, i32
  }
  func.func @transform_5(%arg0: i32) -> (i32, i32) {
    %c0_i32 = arith.constant 0 : i32
    %c0_i32_0 = arith.constant 0 : i32
    %c0_i32_1 = arith.constant 0 : i32
    return %c0_i32, %c0_i32_0 : i32, i32
  }
  func.func @transform_6(%arg0: i32) -> (i32, i32) {
    %c0_i32 = arith.constant 0 : i32
    %c0_i32_0 = arith.constant 0 : i32
    %c0_i32_1 = arith.constant 0 : i32
    return %c0_i32, %c0_i32_0 : i32, i32
  }
  func.func @transform_7(%arg0: i32) -> (i32, i32) {
    %c0_i32 = arith.constant 0 : i32
    %c0_i32_0 = arith.constant 0 : i32
    %c0_i32_1 = arith.constant 0 : i32
    return %c0_i32, %c0_i32_0 : i32, i32
  }
  func.func @transform_8(%arg0: i32) -> (i32, i32) {
    %c0_i32 = arith.constant 0 : i32
    %c0_i32_0 = arith.constant 0 : i32
    %c0_i32_1 = arith.constant 0 : i32
    return %c0_i32, %c0_i32_0 : i32, i32
  }
  func.func @transform_9(%arg0: i32) -> (i32, i32) {
    %c0_i32 = arith.constant 0 : i32
    %c0_i32_0 = arith.constant 0 : i32
    %c0_i32_1 = arith.constant 0 : i32
    return %c0_i32, %c0_i32_0 : i32, i32
  }
  func.func @transform_10(%arg0: i32) -> (i32, i32) {
    %c0_i32 = arith.constant 0 : i32
    %c0_i32_0 = arith.constant 0 : i32
    %c0_i32_1 = arith.constant 0 : i32
    return %c0_i32, %c0_i32_0 : i32, i32
  }
  func.func @transform_11(%arg0: i32) -> (i32, i32) {
    %c0_i32 = arith.constant 0 : i32
    %c0_i32_0 = arith.constant 0 : i32
    %c0_i32_1 = arith.constant 0 : i32
    return %c0_i32, %c0_i32_0 : i32, i32
  }
  func.func @transform_12(%arg0: i32) -> (i32, i32) {
    %c0_i32 = arith.constant 0 : i32
    %c0_i32_0 = arith.constant 0 : i32
    %c0_i32_1 = arith.constant 0 : i32
    return %c0_i32, %c0_i32_0 : i32, i32
  }
  func.func @transform_13(%arg0: i32) -> (i32, i32) {
    %c0_i32 = arith.constant 0 : i32
    %c0_i32_0 = arith.constant 0 : i32
    %c0_i32_1 = arith.constant 0 : i32
    return %c0_i32, %c0_i32_0 : i32, i32
  }
  func.func @transform_14(%arg0: i32) -> (i32, i32) {
    %c0_i32 = arith.constant 0 : i32
    %c0_i32_0 = arith.constant 0 : i32
    %c0_i32_1 = arith.constant 0 : i32
    return %c0_i32, %c0_i32_0 : i32, i32
  }
  func.func @transform_15(%arg0: i32) -> (i32, i32) {
    %c0_i32 = arith.constant 0 : i32
    %c0_i32_0 = arith.constant 0 : i32
    %c0_i32_1 = arith.constant 0 : i32
    return %c0_i32, %c0_i32_0 : i32, i32
  }
  func.func @transform_16(%arg0: i32) -> (i32, i32) {
    %c0_i32 = arith.constant 0 : i32
    %c0_i32_0 = arith.constant 0 : i32
    %c0_i32_1 = arith.constant 0 : i32
    return %c0_i32, %c0_i32_0 : i32, i32
  }
  func.func @transform_17(%arg0: i32) -> (i32, i32) {
    %c0_i32 = arith.constant 0 : i32
    %c0_i32_0 = arith.constant 0 : i32
    %c0_i32_1 = arith.constant 0 : i32
    return %c0_i32, %c0_i32_0 : i32, i32
  }
  func.func @transform_18(%arg0: i32) -> (i32, i32) {
    %c0_i32 = arith.constant 0 : i32
    %c0_i32_0 = arith.constant 0 : i32
    %c0_i32_1 = arith.constant 0 : i32
    return %c0_i32, %c0_i32_0 : i32, i32
  }
  func.func @transform_19(%arg0: i32) -> (i32, i32) {
    %c0_i32 = arith.constant 0 : i32
    %c0_i32_0 = arith.constant 0 : i32
    %c0_i32_1 = arith.constant 0 : i32
    return %c0_i32, %c0_i32_0 : i32, i32
  }
  func.func @transform_20(%arg0: i32) -> (i32, i32) {
    %c0_i32 = arith.constant 0 : i32
    %c0_i32_0 = arith.constant 0 : i32
    %c0_i32_1 = arith.constant 0 : i32
    return %c0_i32, %c0_i32_0 : i32, i32
  }
  func.func @transform_21(%arg0: i32) -> (i32, i32) {
    %c0_i32 = arith.constant 0 : i32
    %c0_i32_0 = arith.constant 0 : i32
    return %arg0, %c0_i32 : i32, i32
  }
}

</mosaic_0001>

<bundles_post_ra>
// kernel: tpu_custom_call.1
= control target key start
LH: loop header
LB: loop body
LE: loop exit
PB: predicated region body
PF: predicated region fallthrough
CT: control target
= control target key end

     0   :  { %s3305_s0 = inlined_call_operand.vmem [shape: f32[16,32], index: 0, kind: input, shape index: {}]   ;;  %s3306_s1 = inlined_call_operand.vmem [shape: f32[2,8,1], index: 1, kind: input, shape index: {}]   ;;  %s3307_s2 = inlined_call_operand.vmem [shape: f32[32,32], index: 2, kind: input, shape index: {}]   ;;  %s3308_s3 = inlined_call_operand.vmem [shape: f32[1,32], index: 3, kind: input, shape index: {}]   ;;  %s3309_s4 = inlined_call_operand.vmem [shape: f32[1,32], index: 4, kind: input, shape index: {}]   ;;  %s3310_s5 = inlined_call_operand.vmem [shape: f32[32,32], index: 5, kind: input, shape index: {}]   ;;  %s3311_s6 = inlined_call_operand.vmem [shape: f32[1,32], index: 6, kind: input, shape index: {}]   ;;  %s3312_s7 = inlined_call_operand.vmem [shape: f32[32,32], index: 7, kind: input, shape index: {}]   ;;  %s3313_s8 = inlined_call_operand.vmem [shape: f32[1,32], index: 8, kind: input, shape index: {}]   ;;  %s3314_s9 = inlined_call_operand.vmem [shape: f32[32,32], index: 9, kind: input, shape index: {}]   ;;  %s3315_s10 = inlined_call_operand.vmem [shape: f32[1,32], index: 10, kind: input, shape index: {}]   ;;  %s3316_s11 = inlined_call_operand.vmem [shape: f32[32,32], index: 11, kind: input, shape index: {}]   ;;  %s3317_s12 = inlined_call_operand.vmem [shape: f32[1,32], index: 12, kind: input, shape index: {}]   ;;  %s3318_s13 = inlined_call_operand.vmem [shape: f32[32,2048], index: 13, kind: input, shape index: {}]   ;;  %s3319_s14 = inlined_call_operand.vmem [shape: f32[1,2048], index: 14, kind: input, shape index: {}]   ;;  %s3320_s15 = inlined_call_operand.vmem [shape: f32[2048,32], index: 15, kind: input, shape index: {}]   ;;  %s3321_s16 = inlined_call_operand.vmem [shape: f32[1,32], index: 16, kind: input, shape index: {}]   ;;  %s3322_s17 = inlined_call_operand.vmem [shape: f32[1,32], index: 17, kind: input, shape index: {}]   ;;  %s3323_s18 = inlined_call_operand.vmem [shape: f32[1,32], index: 18, kind: input, shape index: {}]   ;;  %s3324_s19 = inlined_call_operand.vmem [shape: f32[1,32], index: 19, kind: input, shape index: {}]   ;;  %s3325_s20 = inlined_call_operand.vmem [shape: f32[1,32], index: 20, kind: input, shape index: {}]   ;;  %s3326_s21 = inlined_call_operand.hbm [shape: f32[16,32], index: 21, kind: output, shape index: {}]  }
   0x1   :  { %3331 = sst [smem:[#allocation5_spill]] %s3305_s0 }
   0x2   :  { %3332 = sst [smem:[#allocation6_spill]] %s3306_s1 }
   0x3   :  { %3333 = sst [smem:[#allocation7_spill]] %s3307_s2 }
   0x4   :  { %3334 = sst [smem:[#allocation8_spill]] %s3308_s3 }
   0x5   :  { %3335 = sst [smem:[#allocation9_spill]] %s3309_s4 }
   0x6   :  { %3336 = sst [smem:[#allocation10_spill]] %s3310_s5 }
   0x7   :  { %s3337_s26 = sld [smem:[#allocation5_spill]]  ;;  %vm71_vm0 = vcmask 261120  }
   0xd   :  { %v69_v0 = vld [vmem:[%s3337_s26] sm:$0xff]  ;;  %v70_v2 = vld [vmem:[%s3337_s26 + $0x8] sm:$0xff] }
   0xe   :  { %v72_v1 = vsel %vm71_vm0, %v69_v0, 0.0 }
   0xf   :  { %73 = vadd.xlane.f32.xlu0 %v72_v1 }
  0x10   :  { %26 = vsyncpa [#allocation3], 0  ;;  %v75_v3 = vsel %vm71_vm0, %v70_v2, 0.0  ;;  %v1907_v4 = vmov 32.0   ;;  %s3338_s0 = sld [smem:[#allocation10_spill]]  ;;  %v175_v22 = vld [vmem:[%s3312_s7 + $0x18] sm:$0xff] }
  0x11   :  { %1859 = vrcp.f32 %v1907_v4  ;;  %v206_v23 = vld [vmem:[%s3314_s9 + $0x18] sm:$0xff]  ;;  %192 = vmatpush.msra.mxu1 %v175_v22  ;;  %v174_v25 = vld [vmem:[%s3312_s7 + $0x10] sm:$0xff]  ;;  %v173_v28 = vld [vmem:[%s3312_s7 + $0x8] sm:$0xff]  ;;  %s3340_s27 = sld [smem:[#allocation9_spill]]  ;;  %vm266_vm8 = vcmask 64512   ;;  %s1909_s2 = smov [#allocation2]  }
  0x12   :  { %223 = vmatpush.msra.mxu2 %v206_v23  ;;  %v205_v26 = vld [vmem:[%s3314_s9 + $0x10] sm:$0xff]  ;;  %v204_v29 = vld [vmem:[%s3314_s9 + $0x8] sm:$0xff]  ;;  %v172_v31 = vld [vmem:[%s3312_s7] sm:$0xff]  ;;  %s3341_s30 = sld [smem:[#allocation6_spill]]  ;;  %s1776_s7 = sshll.u32 %s1909_s2, 4  ;;  %s1777_s7 = int_to_ptr.vmem [resolvable:$true] %s1776_s7 }
  0x13   :  { %193 = vmatpush.msra.mxu1 %v174_v25  ;;  %v203_v32 = vld [vmem:[%s3314_s9] sm:$0xff]  ;;  %s3342_s23 = sld [smem:[#allocation7_spill]]  ;;  %s1911_s25 = smov 8  }
  0x14   :  { %224 = vmatpush.msra.mxu2 %v205_v26  ;;  %v1851_v61 = vld [vmem:[%s3313_s8] ss:$0 sm:$0xff] }
  0x15   :  { %194 = vmatpush.msra.mxu1 %v173_v28 }
  0x16   :  { %v138_v21 = vld [vmem:[%s3338_s0 + $0x18] sm:$0xff]  ;;  %v137_v24 = vld [vmem:[%s3338_s0 + $0x10] sm:$0xff]  ;;  %v136_v27 = vld [vmem:[%s3338_s0 + $0x8] sm:$0xff]  ;;  %225 = vmatpush.msra.mxu2 %v204_v29 }
  0x17   :  { %76 = vadd.xlane.f32.xlu0 %v75_v3  ;;  %v1860_v5 = vpop.eup %1859  ;;  %161 = vmatpush.msra.mxu0 %v138_v21  ;;  %v135_v30 = vld [vmem:[%s3338_s0] sm:$0xff]  ;;  %s3339_s0 = sld [smem:[#allocation8_spill]] }
  0x18   :  { %v79_v6 = vmul.f32 32.0, %v1860_v5  ;;  %vm83_vm1 = vweird.f32 %v1860_v5  ;;  %195 = vmatpush.msra.mxu1 %v172_v31  ;;  %226 = vmatpush.msra.mxu2 %v203_v32  ;;  %v1849_v51 = vld [vmem:[%s3340_s27] ss:$0 sm:$0xff] }
  0x19   :  { %162 = vmatpush.msra.mxu0 %v137_v24  ;;  %v384_v24 = vld [vmem:[%s3342_s23 + $0x18] sm:$0xff]  ;;  %v383_v25 = vld [vmem:[%s3342_s23 + $0x10] sm:$0xff]  ;;  %v382_v28 = vld [vmem:[%s3342_s23 + $0x8] sm:$0xff] }
  0x1a   :  { %v80_v7 = vsub.f32 1.0, %v79_v6  ;;  %v381_v32 = vld [vmem:[%s3342_s23] sm:$0xff] }
  0x1b   :  { %163 = vmatpush.msra.mxu0 %v136_v27 }
  0x1c   :  { %v81_v8 = vmul.f32 %v1860_v5, %v80_v7 }
  0x1d   :  { %164 = vmatpush.msra.mxu0 %v135_v30  ;;  %v1848_v47 = vld [vmem:[%s3339_s0] ss:$0 sm:$0xff] }
  0x1e   :  { %v82_v9 = vadd.f32 %v1860_v5, %v81_v8  ;;  %v1850_v30 = vld [vmem:[%s3311_s6] ss:$0 sm:$0xff] }
  0x20   :  { %v2030_v10 = vsel %vm83_vm1, %v1860_v5, %v82_v9 }
  0x82   :  { %v74_v11 = vpop.xlane.xlu0 %73 }
  0x83   :  { %v85_v12 = vmul.f32 %v2030_v10, %v74_v11 }
  0x85   :  { %v87_v13 = vsub.f32 %v69_v0, %v85_v12  ;;  %v1852_v0 = vld [vmem:[%s3315_s10] ss:$0 sm:$0xff] }
  0x87   :  { %v89_v14 = vmul.f32 %v87_v13, %v87_v13 }
  0x89   :  { %v91_v15 = vsel %vm71_vm0, %v89_v14, 0.0 }
  0x8a   :  { %92 = vadd.xlane.f32.xlu1 %v91_v15  ;;  %v77_v16 = vpop.xlane.xlu0 %76 }
  0x8b   :  { %v86_v17 = vmul.f32 %v2030_v10, %v77_v16 }
  0x8d   :  { %v2035_v18 = vsub.f32 %v70_v2, %v86_v17 }
  0x8f   :  { %v90_v19 = vmul.f32 %v2035_v18, %v2035_v18 }
  0x91   :  { %v94_v20 = vsel %vm71_vm0, %v90_v19, 0.0  ;;  %v439_v19 = vld [vmem:[%s3341_s30] sm:$0xff] }
  0x92   :  { %95 = vadd.xlane.f32.xlu1 %v94_v20  ;;  %v1908_v20 = vmov 0   ;;  %vm457_vm9 = vcmp.gt.f32.partialorder %v439_v19, 0.0 }
  0x93   :  { %1846 = vset.pattern.permute.xlu0 %v1908_v20  ;;  %1847 = vset.pattern.permute.xlu1 %v1908_v20  ;;  %v459_v21 = vsel %vm457_vm9, 1, %v1908_v20 }
  0x94   :  { %462 = vperm.xlu0 %1846, %v459_v21  }
  0xfd   :  { %v93_v33 = vpop.xlane.xlu1 %92 }
  0xfe   :  { %v97_v34 = vmul.f32 %v93_v33, %v2030_v10  ;;  %v440_v33 = vld [vmem:[%s3341_s30 + $0x8] sm:$0xff] }
  0xff   :  { %vm458_vm10 = vcmp.gt.f32.partialorder %v440_v33, 0.0  ;;  %v625_v33 = vld [vmem:[%s3318_s13 + $0x1a8] sm:$0xff] }
 0x100   :  { %v100_v35 = vadd.f32 1e-05, %v97_v34  ;;  %v474_v34 = vld [vmem:[%s3316_s11 + $0x18] sm:$0xff] }
 0x101   :  { %497 = vmatpush.msrb.mxu1 %v474_v34  ;;  %v604_v34 = vld [vmem:[%s3318_s13 + $0x100] sm:$0xff] }
 0x102   :  { %1861 = vrsqrt.f32 %v100_v35  ;;  %vm108_vm3 = vweird.f32 %v100_v35 }
 0x105   :  { %v96_v36 = vpop.xlane.xlu1 %95 }
 0x106   :  { %v98_v37 = vmul.f32 %v96_v36, %v2030_v10  ;;  %v473_v36 = vld [vmem:[%s3316_s11 + $0x10] sm:$0xff] }
 0x107   :  { %498 = vmatpush.msrb.mxu1 %v473_v36  ;;  %v606_v36 = vld [vmem:[%s3318_s13 + $0x110] sm:$0xff] }
 0x108   :  { %v1862_v38 = vpop.eup %1861  ;;  %v101_v39 = vadd.f32 1e-05, %v98_v37  ;;  %v460_v37 = vsel %vm458_vm10, 1, %v1908_v20 }
 0x109   :  { %v103_v40 = vmul.f32 %v1862_v38, %v100_v35  ;;  %vm109_vm2 = vweird.f32 %v1862_v38  ;;  %465 = vperm.xlu1 %1847, %v460_v37   ;;  %v609_v37 = vld [vmem:[%s3318_s13 + $0x128] sm:$0xff] }
 0x10a   :  { %1863 = vrsqrt.f32 %v101_v39  ;;  %vm110_vm4 = vmor %vm108_vm3, %vm109_vm2  ;;  %vm118_vm5 = vweird.f32 %v101_v39 }
 0x10b   :  { %v104_v41 = vmul.f32 %v1862_v38, %v103_v40 }
 0x10d   :  { %v105_v42 = vmul.f32 0.5, %v104_v41 }
 0x10f   :  { %v106_v43 = vsub.f32 1.5, %v105_v42 }
 0x110   :  { %v1864_v44 = vpop.eup %1863 }
 0x111   :  { %v107_v45 = vmul.f32 %v1862_v38, %v106_v43  ;;  %v113_v46 = vmul.f32 %v1864_v44, %v101_v39  ;;  %vm119_vm6 = vweird.f32 %v1864_v44  ;;  %v472_v39 = vld [vmem:[%s3316_s11 + $0x8] sm:$0xff] }
 0x112   :  { %vm120_vm7 = vmor %vm118_vm5, %vm119_vm6  ;;  %499 = vmatpush.msrb.mxu1 %v472_v39  ;;  %v589_v39 = vld [vmem:[%s3318_s13 + $0x88] sm:$0xff] }
 0x113   :  { %v111_v48 = vsel %vm110_vm4, %v1862_v38, %v107_v45  ;;  %v114_v49 = vmul.f32 %v1864_v44, %v113_v46 }
 0x114   :  { %v122_v50 = vmul.f32 %v111_v48, %v87_v13 }
 0x115   :  { %v115_v52 = vmul.f32 0.5, %v114_v49  ;;  %v471_v49 = vld [vmem:[%s3316_s11] sm:$0xff] }
 0x116   :  { %v127_v53 = vmul.f32 %v1848_v47, %v122_v50  ;;  %500 = vmatpush.msrb.mxu1 %v471_v49 }
 0x117   :  { %v116_v54 = vsub.f32 1.5, %v115_v52 }
 0x118   :  { %v2084_v55 = vadd.f32 %v1849_v51, %v127_v53 }
 0x119   :  { %v117_v56 = vmul.f32 %v1864_v44, %v116_v54 }
 0x11a   :  { %1790 = vmatmul.msk.f32.vlgmr.msra.gmra.mxu0 %vm71_vm0, %v2084_v55  ;;  %1792 = vmatmul.msk.f32.vlgmr.msra.gmra.mxu1 %vm71_vm0, %v2084_v55 }
 0x11b   :  { %v121_v57 = vsel %vm120_vm7, %v1864_v44, %v117_v56  ;;  %1794 = vmatmul.msk.f32.vlgmr.msra.gmra.mxu2 %vm71_vm0, %v2084_v55 }
 0x11c   :  { %v123_v58 = vmul.f32 %v121_v57, %v2035_v18  ;;  %v463_v57 = vpop.permute.xlu0 %462 }
 0x11d   :  { %vm467_vm11 = vcmp.eq.s32.totalorder %v463_v57, 1 }
 0x11e   :  { %v128_v59 = vmul.f32 %v1848_v47, %v123_v58 }
 0x120   :  { %v2093_v60 = vadd.f32 %v1849_v51, %v128_v59 }
 0x122   :  { %1791 = vmatmul.msk.f32.gmra.mxu0 %vm71_vm0, %v2093_v60  ;;  %1793 = vmatmul.msk.f32.gmra.mxu1 %vm71_vm0, %v2093_v60 }
 0x123   :  { %1795 = vmatmul.msk.f32.gmra.mxu2 %vm71_vm0, %v2093_v60 }
 0x197   :  { %v197_v62 = vpop.f32.mrf.mxu1  ;;  %v166_v17 = vpop.f32.mrf.mxu0 }
 0x198   :  { %v198_v63 = vadd.f32 %v1851_v61, %v197_v62  ;;  %v167_v40 = vadd.f32 %v1850_v30, %v166_v17 }
 0x19a   :  { %234 = vxpose.xlu2.b32.start.end [1/1] (short) (narrow) %v198_v63, 32 }
 0x19e   :  { %v228_v1 = vpop.f32.mrf.mxu2 }
 0x19f   :  { %v2107_v2 = vadd.f32 %v1852_v0, %v228_v1  ;;  %v200_v5 = vpop.f32.mrf.mxu1  ;;  %v169_v23 = vpop.f32.mrf.mxu0 }
 0x1a0   :  { %v201_v6 = vadd.f32 %v1851_v61, %v200_v5  ;;  %v170_v48 = vadd.f32 %v1850_v30, %v169_v23  ;;  %v621_v30 = vld [vmem:[%s3318_s13 + $0x188] sm:$0xff] }
 0x1a1   :  { %294 = vmatpush.msra.mxu3 %v2107_v2  ;;  %v441_v50 = vsel %vm71_vm0, %v2107_v2, 0.0 }
 0x1a2   :  { %v442_v51 = vrot.slane %v441_v50, 4 }
 0x1a4   :  { %v443_v52 = vadd.f32 %v442_v51, %v441_v50 }
 0x1a6   :  { %v231_v3 = vpop.f32.mrf.mxu2  ;;  %v444_v53 = vrot.slane %v443_v52, 2 }
 0x1a7   :  { %v2110_v4 = vadd.f32 %v1852_v0, %v231_v3 }
 0x1a8   :  { %v445_v54 = vadd.f32 %v444_v53, %v443_v52 }
 0x1a9   :  { %367 = vmatpush.msrb.mxu0 %v2110_v4  ;;  %v448_v59 = vsel %vm71_vm0, %v2110_v4, 0.0  ;;  %v1853_v4 = vld [vmem:[%s3317_s12] ss:$0 sm:$0xff] }
 0x1aa   :  { %v446_v56 = vrot.slane %v445_v54, 1  ;;  %v449_v63 = vrot.slane %v448_v59, 4 }
 0x1ab   :  { %805 = vmatpush.msra.mxu0 %v625_v33  ;;  %v633_v33 = vld [vmem:[%s3318_s13 + $0x1e8] sm:$0xff] }
 0x1ac   :  { %v447_v58 = vadd.f32 %v446_v56, %v445_v54  ;;  %v450_v1 = vadd.f32 %v449_v63, %v448_v59  ;;  %v2237_v63 = vld [vmem:[%s3323_s18] ss:$0 sm:$0xff] }
 0x1ad   :  { %806 = vmatpush.msra.mxu0 %v609_v37  ;;  %v617_v37 = vld [vmem:[%s3318_s13 + $0x168] sm:$0xff] }
 0x1ae   :  { %v455_v61 = vmul.f32 -1e+09, %v447_v58  ;;  %v451_v3 = vrot.slane %v450_v1, 2 }
 0x1b0   :  { %v452_v2 = vadd.f32 %v451_v3, %v450_v1  ;;  %v623_v1 = vld [vmem:[%s3318_s13 + $0x198] sm:$0xff]  ;;  %v624_v3 = vld [vmem:[%s3318_s13 + $0x1a0] sm:$0xff] }
 0x1b2   :  { %v453_v5 = vrot.slane %v452_v2, 1 }
 0x1ba   :  { %308 = vxpose.xlu2.b32.start.end [1/1] (short) (narrow) %v201_v6, 32  ;;  %v466_v6 = vpop.permute.xlu1 %465 }
 0x1bb   :  { %vm468_vm12 = vcmp.eq.s32.totalorder %v466_v6, 1 }
 0x233   :  { %v250_v7 = vpop.trf.xlu2 }
 0x234   :  { %1796 = vmatmul.msk.f32.vlgmr.msra.gmra.mxu3 %vm266_vm8, %v250_v7  ;;  %v454_v7 = vadd.f32 %v453_v5, %v452_v2  ;;  %v626_v2 = vld [vmem:[%s3318_s13 + $0x1b0] sm:$0xff] }
 0x23b   :  { %v251_v8 = vpop.trf.xlu2 }
 0x23c   :  { %1797 = vmatmul.msk.f32.gmra.mxu3 %vm266_vm8, %v251_v8  ;;  %v456_v8 = vmul.f32 -1e+09, %v454_v7  ;;  %v629_v7 = vld [vmem:[%s3318_s13 + $0x1c8] sm:$0xff] }
 0x243   :  { %v252_v9 = vpop.trf.xlu2 }
 0x244   :  { %1798 = vmatmul.msk.f32.gmra.mxu3 %vm266_vm8, %v252_v9 }
 0x24b   :  { %v253_v11 = vpop.trf.xlu2 }
 0x24c   :  { %1799 = vmatmul.msk.f32.gmra.mxu3 %vm266_vm8, %v253_v11 }
 0x253   :  { %v324_v12 = vpop.trf.xlu2 }
 0x254   :  { %1800 = vmatmul.msk.f32.vlgmr.msrb.gmra.mxu0 %vm266_vm8, %v324_v12 }
 0x25b   :  { %v325_v13 = vpop.trf.xlu2 }
 0x25c   :  { %1801 = vmatmul.msk.f32.gmra.mxu0 %vm266_vm8, %v325_v13 }
 0x263   :  { %v326_v14 = vpop.trf.xlu2 }
 0x264   :  { %1802 = vmatmul.msk.f32.gmra.mxu0 %vm266_vm8, %v326_v14 }
 0x26b   :  { %v327_v15 = vpop.trf.xlu2 }
 0x26c   :  { %1803 = vmatmul.msk.f32.gmra.mxu0 %vm266_vm8, %v327_v15 }
 0x2b7   :  { %v296_v16 = vpop.f32.mrf.mxu3 }
 0x2b8   :  { %v385_v38 = vmul.f32 %v381_v32, %v296_v16 }
 0x2bf   :  { %v299_v18 = vpop.f32.mrf.mxu3 }
 0x2c0   :  { %v386_v35 = vmul.f32 %v382_v28, %v299_v18 }
 0x2c7   :  { %v302_v22 = vpop.f32.mrf.mxu3 }
 0x2c8   :  { %v387_v31 = vmul.f32 %v383_v25, %v302_v22 }
 0x2cf   :  { %v305_v26 = vpop.f32.mrf.mxu3 }
 0x2d0   :  { %v388_v27 = vmul.f32 %v384_v24, %v305_v26 }
 0x2d1   :  { %v369_v29 = vpop.f32.mrf.mxu0 }
 0x2d2   :  { %408 = vmatpush.msrb.mxu3 %v388_v27  ;;  %v389_v47 = vmul.f32 %v381_v32, %v369_v29  ;;  %v620_v29 = vld [vmem:[%s3318_s13 + $0x180] sm:$0xff] }
 0x2d4   :  { %409 = vmatpush.msrb.mxu3 %v387_v31  ;;  %v622_v31 = vld [vmem:[%s3318_s13 + $0x190] sm:$0xff] }
 0x2d5   :  { %736 = vmatpush.msra.mxu1 %v622_v31  ;;  %v628_v31 = vld [vmem:[%s3318_s13 + $0x1c0] sm:$0xff] }
 0x2d6   :  { %410 = vmatpush.msrb.mxu3 %v386_v35  ;;  %v605_v35 = vld [vmem:[%s3318_s13 + $0x108] sm:$0xff] }
 0x2d7   :  { %737 = vmatpush.msra.mxu1 %v606_v36  ;;  %v614_v36 = vld [vmem:[%s3318_s13 + $0x150] sm:$0xff] }
 0x2d8   :  { %411 = vmatpush.msrb.mxu3 %v385_v38  ;;  %v588_v38 = vld [vmem:[%s3318_s13 + $0x80] sm:$0xff] }
 0x2d9   :  { %v372_v41 = vpop.f32.mrf.mxu0  ;;  %1804 = vmatmul.msk.f32.vlgmr.msrb.gmra.mxu3 %vm71_vm0, %v167_v40  ;;  %v590_v40 = vld [vmem:[%s3318_s13 + $0x90] sm:$0xff] }
 0x2da   :  { %v390_v46 = vmul.f32 %v382_v28, %v372_v41  ;;  %713 = vmatpush.msra.mxu3 %v621_v30  ;;  %v593_v41 = vld [vmem:[%s3318_s13 + $0xa8] sm:$0xff]  ;;  %738 = vmatpush.msra.mxu1 %v590_v40  ;;  %v627_v30 = vld [vmem:[%s3318_s13 + $0x1b8] sm:$0xff]  ;;  %v598_v40 = vld [vmem:[%s3318_s13 + $0xd0] sm:$0xff] }
 0x2db   :  { %807 = vmatpush.msra.mxu0 %v593_v41  ;;  %v601_v41 = vld [vmem:[%s3318_s13 + $0xe8] sm:$0xff] }
 0x2dc   :  { %714 = vmatpush.msra.mxu3 %v605_v35  ;;  %v612_v35 = vld [vmem:[%s3318_s13 + $0x140] sm:$0xff] }
 0x2de   :  { %715 = vmatpush.msra.mxu3 %v589_v39  ;;  %v596_v39 = vld [vmem:[%s3318_s13 + $0xc0] sm:$0xff] }
 0x2e1   :  { %v375_v42 = vpop.f32.mrf.mxu0 }
 0x2e2   :  { %v391_v45 = vmul.f32 %v383_v25, %v375_v42  ;;  %v572_v42 = vld [vmem:[%s3318_s13] sm:$0xff] }
 0x2e9   :  { %v378_v43 = vpop.f32.mrf.mxu0 }
 0x2ea   :  { %v392_v44 = vmul.f32 %v384_v24, %v378_v43  ;;  %v573_v43 = vld [vmem:[%s3318_s13 + $0x8] sm:$0xff] }
 0x2eb   :  { %716 = vmatpush.msra.mxu3 %v573_v43  ;;  %v580_v43 = vld [vmem:[%s3318_s13 + $0x40] sm:$0xff] }
 0x2ec   :  { %431 = vmatpush.msrb.mxu2 %v392_v44  ;;  %v574_v44 = vld [vmem:[%s3318_s13 + $0x10] sm:$0xff] }
 0x2ed   :  { %739 = vmatpush.msra.mxu1 %v574_v44  ;;  %782 = vmatpush.msrb.mxu3 %v624_v3  ;;  %v582_v44 = vld [vmem:[%s3318_s13 + $0x50] sm:$0xff]  ;;  %v635_v3 = vld [vmem:[%s3318_s13 + $0x1f8] sm:$0xff] }
 0x2ee   :  { %432 = vmatpush.msrb.mxu2 %v391_v45  ;;  %v577_v45 = vld [vmem:[%s3318_s13 + $0x28] sm:$0xff] }
 0x2ef   :  { %808 = vmatpush.msra.mxu0 %v577_v45  ;;  %v585_v45 = vld [vmem:[%s3318_s13 + $0x68] sm:$0xff] }
 0x2f0   :  { %433 = vmatpush.msrb.mxu2 %v390_v46 }
 0x2f1   :  { %897 = vmatpush.msrb.mxu0 %v629_v7  ;;  %v619_v7 = vld [vmem:[%s3318_s13 + $0x178] sm:$0xff] }
 0x2f2   :  { %434 = vmatpush.msrb.mxu2 %v389_v47 }
 0x2f3   :  { %1805 = vmatmul.msk.f32.vlgmr.msrb.gmra.mxu2 %vm71_vm0, %v170_v48 }
 0x2f4   :  { %690 = vmatpush.msra.mxu2 %v620_v29 }
 0x2f6   :  { %691 = vmatpush.msra.mxu2 %v604_v34  ;;  %v611_v34 = vld [vmem:[%s3318_s13 + $0x138] sm:$0xff] }
 0x2f8   :  { %692 = vmatpush.msra.mxu2 %v588_v38  ;;  %v595_v38 = vld [vmem:[%s3318_s13 + $0xb8] sm:$0xff] }
 0x2fa   :  { %693 = vmatpush.msra.mxu2 %v572_v42  ;;  %v579_v42 = vld [vmem:[%s3318_s13 + $0x38] sm:$0xff] }
 0x2fc   :  { %759 = vmatpush.msrb.mxu2 %v623_v1  ;;  %v1125_v1 = vld [vmem:[%s3320_s15 + $0x178] sm:$0xff] }
 0x35c   :  { %v413_v62 = vpop.f32.mrf.mxu3 }
 0x35d   :  { %v469_v0 = vsel %vm467_vm11, %v413_v62, %v455_v61  ;;  %v2232_v61 = vld [vmem:[%s3322_s17] ss:$0 sm:$0xff] }
 0x35e   :  { %1806 = vmatmul.msk.f32.vlgmr.msrb.gmra.mxu1 %vm71_vm0, %v469_v0 }
 0x35f   :  { %828 = vmatpush.msrb.mxu1 %v626_v2  ;;  %v1093_v2 = vld [vmem:[%s3320_s15 + $0x78] sm:$0xff] }
 0x376   :  { %v436_v9 = vpop.f32.mrf.mxu2 }
 0x377   :  { %v470_v11 = vsel %vm468_vm12, %v436_v9, %v456_v8  ;;  %v607_v8 = vld [vmem:[%s3318_s13 + $0x118] sm:$0xff]  ;;  %v608_v9 = vld [vmem:[%s3318_s13 + $0x120] sm:$0xff] }
 0x378   :  { %1807 = vmatmul.msk.f32.gmra.mxu1 %vm71_vm0, %v470_v11  ;;  %760 = vmatpush.msrb.mxu2 %v607_v8  ;;  %v1092_v8 = vld [vmem:[%s3320_s15 + $0x70] sm:$0xff] }
 0x379   :  { %783 = vmatpush.msrb.mxu3 %v608_v9  ;;  %v1106_v9 = vld [vmem:[%s3320_s15 + $0xe0] sm:$0xff] }
 0x3db   :  { %v502_v12 = vpop.f32.mrf.mxu1 }
 0x3dc   :  { %v503_v13 = vadd.f32 %v1853_v4, %v502_v12  ;;  %v613_v12 = vld [vmem:[%s3318_s13 + $0x148] sm:$0xff] }
 0x3dd   :  { %898 = vmatpush.msrb.mxu0 %v613_v12  ;;  %v1091_v12 = vld [vmem:[%s3320_s15 + $0x68] sm:$0xff] }
 0x3de   :  { %v508_v14 = vadd.f32 %v503_v13, %v2084_v55 }
 0x3e0   :  { %v510_v15 = vsel %vm71_vm0, %v508_v14, 0.0 }
 0x3e1   :  { %511 = vadd.xlane.f32.xlu2 %v510_v15  ;;  %v591_v15 = vld [vmem:[%s3318_s13 + $0x98] sm:$0xff] }
 0x3e2   :  { %761 = vmatpush.msrb.mxu2 %v591_v15  ;;  %v1122_v15 = vld [vmem:[%s3320_s15 + $0x160] sm:$0xff] }
 0x3f5   :  { %v505_v16 = vpop.f32.mrf.mxu1 }
 0x3f6   :  { %v506_v17 = vadd.f32 %v1853_v4, %v505_v16  ;;  %v610_v4 = vld [vmem:[%s3318_s13 + $0x130] sm:$0xff]  ;;  %v592_v16 = vld [vmem:[%s3318_s13 + $0xa0] sm:$0xff] }
 0x3f7   :  { %829 = vmatpush.msrb.mxu1 %v610_v4  ;;  %784 = vmatpush.msrb.mxu3 %v592_v16  ;;  %v603_v4 = vld [vmem:[%s3318_s13 + $0xf8] sm:$0xff] }
 0x3f8   :  { %v509_v18 = vadd.f32 %v506_v17, %v2093_v60  ;;  %v594_v17 = vld [vmem:[%s3318_s13 + $0xb0] sm:$0xff]  ;;  %v587_v16 = vld [vmem:[%s3318_s13 + $0x78] sm:$0xff] }
 0x3f9   :  { %830 = vmatpush.msrb.mxu1 %v594_v17  ;;  %v1090_v17 = vld [vmem:[%s3320_s15 + $0x60] sm:$0xff] }
 0x3fa   :  { %v513_v19 = vsel %vm71_vm0, %v509_v18, 0.0 }
 0x3fb   :  { %514 = vadd.xlane.f32.xlu1 %v513_v19 }
 0x454   :  { %v512_v20 = vpop.xlane.xlu2 %511 }
 0x455   :  { %v516_v21 = vmul.f32 %v512_v20, %v2030_v10  ;;  %v575_v20 = vld [vmem:[%s3318_s13 + $0x18] sm:$0xff] }
 0x456   :  { %762 = vmatpush.msrb.mxu2 %v575_v20  ;;  %v1089_v20 = vld [vmem:[%s3320_s15 + $0x58] sm:$0xff] }
 0x457   :  { %v2170_v22 = vsub.f32 %v508_v14, %v516_v21  ;;  %v576_v21 = vld [vmem:[%s3318_s13 + $0x20] sm:$0xff] }
 0x458   :  { %785 = vmatpush.msrb.mxu3 %v576_v21  ;;  %v1103_v21 = vld [vmem:[%s3320_s15 + $0xc8] sm:$0xff] }
 0x459   :  { %v520_v23 = vmul.f32 %v2170_v22, %v2170_v22 }
 0x45b   :  { %v522_v55 = vsel %vm71_vm0, %v520_v23, 0.0  ;;  %v581_v23 = vld [vmem:[%s3318_s13 + $0x48] sm:$0xff] }
 0x45c   :  { %523 = vadd.xlane.f32.xlu0 %v522_v55 }
 0x46e   :  { %v515_v24 = vpop.xlane.xlu1 %514 }
 0x46f   :  { %v517_v25 = vmul.f32 %v515_v24, %v2030_v10 }
 0x471   :  { %v2176_v26 = vsub.f32 %v509_v18, %v517_v25  ;;  %v597_v18 = vld [vmem:[%s3318_s13 + $0xc8] sm:$0xff] }
 0x472   :  { %899 = vmatpush.msrb.mxu0 %v597_v18  ;;  %v1104_v18 = vld [vmem:[%s3320_s15 + $0xd0] sm:$0xff] }
 0x473   :  { %v521_v60 = vmul.f32 %v2176_v26, %v2176_v26 }
 0x474   :  { %900 = vmatpush.msrb.mxu0 %v581_v23  ;;  %v1088_v23 = vld [vmem:[%s3320_s15 + $0x50] sm:$0xff] }
 0x475   :  { %v525_v27 = vsel %vm71_vm0, %v521_v60, 0.0 }
 0x476   :  { %526 = vadd.xlane.f32.xlu1 %v525_v27 }
 0x4cf   :  { %v524_v28 = vpop.xlane.xlu0 %523 }
 0x4d0   :  { %v528_v32 = vmul.f32 0.032258064, %v524_v28 }
 0x4d2   :  { %1865 = vrsqrt.f32 %v528_v32  ;;  %vm537_vm13 = vcmp.eq.f32.partialorder %v528_v32, inf  ;;  %v540_v53 = vand.u32 2147483648, %v528_v32  ;;  %vm539_vm14 = vcmp.eq.f32.partialorder %v528_v32, 0.0 }
 0x4d8   :  { %v1866_v46 = vpop.eup %1865 }
 0x4d9   :  { %v531_v47 = vmul.f32 %v1866_v46, %v528_v32 }
 0x4db   :  { %v532_v48 = vmul.f32 %v1866_v46, %v531_v47 }
 0x4dd   :  { %v533_v49 = vmul.f32 0.5, %v532_v48 }
 0x4df   :  { %v534_v50 = vsub.f32 1.5, %v533_v49 }
 0x4e1   :  { %v535_v51 = vmul.f32 %v1866_v46, %v534_v50  ;;  %v632_v50 = vld [vmem:[%s3318_s13 + $0x1e0] sm:$0xff] }
 0x4e3   :  { %v536_v52 = vmul.f32 %v535_v51, %v528_v32  ;;  %v634_v51 = vld [vmem:[%s3318_s13 + $0x1f0] sm:$0xff] }
 0x4e5   :  { %v538_v54 = vsel %vm537_vm13, %v528_v32, %v536_v52  ;;  %v630_v32 = vld [vmem:[%s3318_s13 + $0x1d0] sm:$0xff]  ;;  %v615_v52 = vld [vmem:[%s3318_s13 + $0x158] sm:$0xff] }
 0x4e6   :  { %v541_v56 = vsel %vm539_vm14, %v540_v53, %v538_v54  ;;  %v616_v53 = vld [vmem:[%s3318_s13 + $0x160] sm:$0xff]  ;;  %v618_v54 = vld [vmem:[%s3318_s13 + $0x170] sm:$0xff] }
 0x4e7   :  { %v554_v57 = vadd.f32 1e-06, %v541_v56  ;;  %v599_v56 = vld [vmem:[%s3318_s13 + $0xd8] sm:$0xff] }
 0x4e9   :  { %1867 = vrcp.f32 %v554_v57  ;;  %v527_v58 = vpop.xlane.xlu1 %526  ;;  %v600_v57 = vld [vmem:[%s3318_s13 + $0xe0] sm:$0xff] }
 0x4ea   :  { %v529_v59 = vmul.f32 0.032258064, %v527_v58  ;;  %v602_v58 = vld [vmem:[%s3318_s13 + $0xf0] sm:$0xff] }
 0x4ec   :  { %1869 = vrsqrt.f32 %v529_v59  ;;  %vm549_vm15 = vcmp.eq.f32.partialorder %v529_v59, inf  ;;  %v552_v60 = vand.u32 2147483648, %v529_v59  ;;  %vm551_vm1 = vcmp.eq.f32.partialorder %v529_v59, 0.0 }
 0x4ef   :  { %v1868_v62 = vpop.eup %1867 }
 0x4f0   :  { %v559_v0 = vmul.f32 %v1868_v62, %v2170_v22  ;;  %v578_v22 = vld [vmem:[%s3318_s13 + $0x30] sm:$0xff] }
 0x4f1   :  { %831 = vmatpush.msrb.mxu1 %v578_v22  ;;  %v586_v62 = vld [vmem:[%s3318_s13 + $0x70] sm:$0xff] }
 0x4f2   :  { %v1870_v5 = vpop.eup %1869  ;;  %v564_v6 = vmul.f32 %v2232_v61, %v559_v0  ;;  %v1108_v0 = vld [vmem:[%s3320_s15 + $0xf0] sm:$0xff] }
 0x4f3   :  { %v543_v11 = vmul.f32 %v1870_v5, %v529_v59  ;;  %v1120_v22 = vld [vmem:[%s3320_s15 + $0x150] sm:$0xff] }
 0x4f4   :  { %v2266_v13 = vadd.f32 %v2237_v63, %v564_v6  ;;  %v1124_v6 = vld [vmem:[%s3320_s15 + $0x170] sm:$0xff] }
 0x4f5   :  { %v544_v14 = vmul.f32 %v1870_v5, %v543_v11  ;;  %v1123_v11 = vld [vmem:[%s3320_s15 + $0x168] sm:$0xff] }
 0x4f6   :  { %1808 = vmatmul.msk.f32.vlgmr.msra.gmra.mxu2 %vm71_vm0, %v2266_v13  ;;  %1810 = vmatmul.msk.f32.vlgmr.msra.gmra.mxu3 %vm71_vm0, %v2266_v13 }
 0x4f7   :  { %v545_v19 = vmul.f32 0.5, %v544_v14  ;;  %1812 = vmatmul.msk.f32.vlgmr.msra.gmra.mxu1 %vm71_vm0, %v2266_v13  ;;  %1818 = vmatmul.msk.f32.vlgmr.msra.gmra.mxu0 %vm71_vm0, %v2266_v13  ;;  %v1105_v14 = vld [vmem:[%s3320_s15 + $0xd8] sm:$0xff] }
 0x4f8   :  { %851 = vmatpush.msra.mxu2 %v627_v30  ;;  %874 = vmatpush.msra.mxu3 %v628_v31  ;;  %v1085_v30 = vld [vmem:[%s3320_s15 + $0x38] sm:$0xff] }
 0x4f9   :  { %v546_v55 = vsub.f32 1.5, %v545_v19  ;;  %920 = vmatpush.msra.mxu1 %v630_v32  ;;  %989 = vmatpush.msra.mxu0 %v633_v33  ;;  %v1121_v19 = vld [vmem:[%s3320_s15 + $0x158] sm:$0xff]  ;;  %v1099_v33 = vld [vmem:[%s3320_s15 + $0xa8] sm:$0xff] }
 0x4fa   :  { %852 = vmatpush.msra.mxu2 %v611_v34  ;;  %875 = vmatpush.msra.mxu3 %v612_v35  ;;  %v1141_v31 = vld [vmem:[%s3320_s15 + $0x1f8] sm:$0xff]  ;;  %v1140_v34 = vld [vmem:[%s3320_s15 + $0x1f0] sm:$0xff] }
 0x4fb   :  { %v547_v24 = vmul.f32 %v1870_v5, %v546_v55  ;;  %921 = vmatpush.msra.mxu1 %v614_v36  ;;  %990 = vmatpush.msra.mxu0 %v617_v37  ;;  %v1107_v5 = vld [vmem:[%s3320_s15 + $0xe8] sm:$0xff]  ;;  %v1102_v55 = vld [vmem:[%s3320_s15 + $0xc0] sm:$0xff]  ;;  %v1117_v32 = vld [vmem:[%s3320_s15 + $0x138] sm:$0xff] }
 0x4fc   :  { %853 = vmatpush.msra.mxu2 %v595_v38  ;;  %876 = vmatpush.msra.mxu3 %v596_v39  ;;  %v1084_v35 = vld [vmem:[%s3320_s15 + $0x30] sm:$0xff]  ;;  %v1139_v36 = vld [vmem:[%s3320_s15 + $0x1e8] sm:$0xff]  ;;  %v1098_v39 = vld [vmem:[%s3320_s15 + $0xa0] sm:$0xff] }
 0x4fd   :  { %v548_v25 = vmul.f32 %v547_v24, %v529_v59  ;;  %922 = vmatpush.msra.mxu1 %v598_v40  ;;  %991 = vmatpush.msra.mxu0 %v601_v41  ;;  %v1087_v24 = vld [vmem:[%s3320_s15 + $0x48] sm:$0xff]  ;;  %v1116_v38 = vld [vmem:[%s3320_s15 + $0x130] sm:$0xff]  ;;  %v1082_v40 = vld [vmem:[%s3320_s15 + $0x20] sm:$0xff] }
 0x4fe   :  { %854 = vmatpush.msra.mxu2 %v579_v42  ;;  %877 = vmatpush.msra.mxu3 %v580_v43  ;;  %v1083_v37 = vld [vmem:[%s3320_s15 + $0x28] sm:$0xff]  ;;  %v1138_v41 = vld [vmem:[%s3320_s15 + $0x1e0] sm:$0xff]  ;;  %v1097_v43 = vld [vmem:[%s3320_s15 + $0x98] sm:$0xff] }
 0x4ff   :  { %v550_v27 = vsel %vm549_vm15, %v529_v59, %v548_v25  ;;  %923 = vmatpush.msra.mxu1 %v582_v44  ;;  %992 = vmatpush.msra.mxu0 %v585_v45  ;;  %v583_v59 = vld [vmem:[%s3318_s13 + $0x58] sm:$0xff]  ;;  %v1119_v25 = vld [vmem:[%s3320_s15 + $0x148] sm:$0xff] }
 0x500   :  { %v553_v28 = vsel %vm551_vm1, %v552_v60, %v550_v27  ;;  %v1101_v60 = vld [vmem:[%s3320_s15 + $0xb8] sm:$0xff]  ;;  %v1086_v27 = vld [vmem:[%s3320_s15 + $0x40] sm:$0xff]  ;;  %v1115_v42 = vld [vmem:[%s3320_s15 + $0x128] sm:$0xff] }
 0x501   :  { %v555_v29 = vadd.f32 1e-06, %v553_v28  ;;  %v1118_v28 = vld [vmem:[%s3320_s15 + $0x140] sm:$0xff]  ;;  %v1081_v44 = vld [vmem:[%s3320_s15 + $0x18] sm:$0xff] }
 0x502   :  { %v1137_v45 = vld [vmem:[%s3320_s15 + $0x1d8] sm:$0xff] }
 0x503   :  { %1871 = vrcp.f32 %v555_v29  ;;  %v1100_v29 = vld [vmem:[%s3320_s15 + $0xb0] sm:$0xff] }
 0x509   :  { %v1872_v46 = vpop.eup %1871 }
 0x50a   :  { %v560_v47 = vmul.f32 %v1872_v46, %v2176_v26  ;;  %v631_v26 = vld [vmem:[%s3318_s13 + $0x1d8] sm:$0xff]  ;;  %v1114_v46 = vld [vmem:[%s3320_s15 + $0x120] sm:$0xff] }
 0x50c   :  { %v565_v48 = vmul.f32 %v2232_v61, %v560_v47  ;;  %v584_v61 = vld [vmem:[%s3318_s13 + $0x60] sm:$0xff]  ;;  %v1096_v47 = vld [vmem:[%s3320_s15 + $0x90] sm:$0xff] }
 0x50e   :  { %v2351_v49 = vadd.f32 %v2237_v63, %v565_v48  ;;  %v1109_v63 = vld [vmem:[%s3320_s15 + $0xf8] sm:$0xff]  ;;  %v1080_v48 = vld [vmem:[%s3320_s15 + $0x10] sm:$0xff] }
 0x510   :  { %1809 = vmatmul.msk.f32.gmra.mxu2 %vm71_vm0, %v2351_v49  ;;  %1811 = vmatmul.msk.f32.gmra.mxu3 %vm71_vm0, %v2351_v49 }
 0x511   :  { %1813 = vmatmul.msk.f32.gmra.mxu1 %vm71_vm0, %v2351_v49  ;;  %1819 = vmatmul.msk.f32.gmra.mxu0 %vm71_vm0, %v2351_v49 }
 0x518   :  { %1814 = vmatmul.msk.f32.vlgmr.msrb.gmra.mxu2 %vm71_vm0, %v2266_v13  ;;  %1816 = vmatmul.msk.f32.vlgmr.msrb.gmra.mxu3 %vm71_vm0, %v2266_v13 }
 0x519   :  { %1820 = vmatmul.msk.f32.vlgmr.msrb.gmra.mxu1 %vm71_vm0, %v2266_v13  ;;  %1826 = vmatmul.msk.f32.vlgmr.msrb.gmra.mxu0 %vm71_vm0, %v2266_v13 }
 0x51a   :  { %943 = vmatpush.msrb.mxu2 %v631_v26  ;;  %966 = vmatpush.msrb.mxu3 %v632_v50  ;;  %v1136_v26 = vld [vmem:[%s3320_s15 + $0x1d0] sm:$0xff]  ;;  %v1113_v50 = vld [vmem:[%s3320_s15 + $0x118] sm:$0xff] }
 0x51b   :  { %1012 = vmatpush.msrb.mxu1 %v634_v51  ;;  %1361 = vmatpush.msrb.mxu0 %v1109_v63  ;;  %v1079_v51 = vld [vmem:[%s3320_s15 + $0x8] sm:$0xff]  ;;  %v1110_v63 = vld [vmem:[%s3320_s15 + $0x100] sm:$0xff] }
 0x51c   :  { %944 = vmatpush.msrb.mxu2 %v615_v52  ;;  %967 = vmatpush.msrb.mxu3 %v616_v53  ;;  %v1095_v52 = vld [vmem:[%s3320_s15 + $0x88] sm:$0xff]  ;;  %v1112_v53 = vld [vmem:[%s3320_s15 + $0x110] sm:$0xff] }
 0x51d   :  { %1013 = vmatpush.msrb.mxu1 %v618_v54  ;;  %1362 = vmatpush.msrb.mxu0 %v1108_v0  ;;  %v1135_v54 = vld [vmem:[%s3320_s15 + $0x1c8] sm:$0xff]  ;;  %v1156_v0 = vld [vmem:[%s3320_s15 + $0x270] sm:$0xff] }
 0x51e   :  { %945 = vmatpush.msrb.mxu2 %v599_v56  ;;  %968 = vmatpush.msrb.mxu3 %v600_v57  ;;  %v1078_v56 = vld [vmem:[%s3320_s15] sm:$0xff] }
 0x51f   :  { %1014 = vmatpush.msrb.mxu1 %v602_v58  ;;  %1363 = vmatpush.msrb.mxu0 %v1107_v5  ;;  %v1094_v57 = vld [vmem:[%s3320_s15 + $0x80] sm:$0xff]  ;;  %v1111_v58 = vld [vmem:[%s3320_s15 + $0x108] sm:$0xff]  ;;  %v1188_v5 = vld [vmem:[%s3320_s15 + $0x370] sm:$0xff] }
 0x520   :  { %1815 = vmatmul.msk.f32.gmra.mxu2 %vm71_vm0, %v2351_v49  ;;  %1817 = vmatmul.msk.f32.gmra.mxu3 %vm71_vm0, %v2351_v49 }
 0x521   :  { %1821 = vmatmul.msk.f32.gmra.mxu1 %vm71_vm0, %v2351_v49  ;;  %1827 = vmatmul.msk.f32.gmra.mxu0 %vm71_vm0, %v2351_v49 }
 0x522   :  { %946 = vmatpush.msrb.mxu2 %v583_v59  ;;  %969 = vmatpush.msrb.mxu3 %v584_v61  ;;  %v1157_v59 = vld [vmem:[%s3320_s15 + $0x278] sm:$0xff] }
 0x523   :  { %1015 = vmatpush.msrb.mxu1 %v586_v62  ;;  %1364 = vmatpush.msrb.mxu0 %v1106_v9  ;;  %v1173_v61 = vld [vmem:[%s3320_s15 + $0x2f8] sm:$0xff]  ;;  %v1134_v62 = vld [vmem:[%s3320_s15 + $0x1c0] sm:$0xff]  ;;  %v1187_v9 = vld [vmem:[%s3320_s15 + $0x368] sm:$0xff] }
 0x525   :  { %1365 = vmatpush.msrb.mxu0 %v1105_v14  ;;  %v1169_v14 = vld [vmem:[%s3320_s15 + $0x2d8] sm:$0xff] }
 0x527   :  { %1366 = vmatpush.msrb.mxu0 %v1104_v18  ;;  %v1132_v18 = vld [vmem:[%s3320_s15 + $0x1b0] sm:$0xff] }
 0x528   :  { %1822 = vmatmul.msk.f32.vlgmr.msra.gmra.mxu2 %vm71_vm0, %v2266_v13  ;;  %1824 = vmatmul.msk.f32.vlgmr.msra.gmra.mxu3 %vm71_vm0, %v2266_v13 }
 0x529   :  { %1828 = vmatmul.msk.f32.vlgmr.msra.gmra.mxu1 %vm71_vm0, %v2266_v13  ;;  %1834 = vmatmul.msk.f32.vlgmr.msra.gmra.mxu0 %vm71_vm0, %v2266_v13 }
 0x52a   :  { %1384 = vmatpush.msra.mxu1 %v1125_v1  ;;  %1035 = vmatpush.msra.mxu2 %v635_v3  ;;  %v1189_v1 = vld [vmem:[%s3320_s15 + $0x378] sm:$0xff]  ;;  %v1172_v3 = vld [vmem:[%s3320_s15 + $0x2f0] sm:$0xff] }
 0x52b   :  { %1338 = vmatpush.msra.mxu3 %v1093_v2  ;;  %1367 = vmatpush.msrb.mxu0 %v1103_v21  ;;  %v1155_v2 = vld [vmem:[%s3320_s15 + $0x268] sm:$0xff] }
 0x52c   :  { %1385 = vmatpush.msra.mxu1 %v1124_v6  ;;  %1036 = vmatpush.msra.mxu2 %v619_v7  ;;  %v1171_v6 = vld [vmem:[%s3320_s15 + $0x2e8] sm:$0xff]  ;;  %v1154_v7 = vld [vmem:[%s3320_s15 + $0x260] sm:$0xff] }
 0x52d   :  { %1339 = vmatpush.msra.mxu3 %v1092_v8  ;;  %1368 = vmatpush.msrb.mxu0 %v1102_v55  ;;  %v1133_v8 = vld [vmem:[%s3320_s15 + $0x1b8] sm:$0xff]  ;;  %v1167_v21 = vld [vmem:[%s3320_s15 + $0x2c8] sm:$0xff] }
 0x52e   :  { %1386 = vmatpush.msra.mxu1 %v1123_v11  ;;  %1037 = vmatpush.msra.mxu2 %v603_v4  ;;  %v1170_v11 = vld [vmem:[%s3320_s15 + $0x2e0] sm:$0xff]  ;;  %v1153_v4 = vld [vmem:[%s3320_s15 + $0x258] sm:$0xff]  ;;  %v1183_v55 = vld [vmem:[%s3320_s15 + $0x348] sm:$0xff] }
 0x52f   :  { %1340 = vmatpush.msra.mxu3 %v1091_v12  ;;  %1369 = vmatpush.msrb.mxu0 %v1101_v60  ;;  %v1186_v12 = vld [vmem:[%s3320_s15 + $0x360] sm:$0xff]  ;;  %v1149_v60 = vld [vmem:[%s3320_s15 + $0x238] sm:$0xff] }
 0x530   :  { %1823 = vmatmul.msk.f32.gmra.mxu2 %vm71_vm0, %v2351_v49  ;;  %1825 = vmatmul.msk.f32.gmra.mxu3 %vm71_vm0, %v2351_v49 }
 0x531   :  { %1829 = vmatmul.msk.f32.gmra.mxu1 %vm71_vm0, %v2351_v49  ;;  %1835 = vmatmul.msk.f32.gmra.mxu0 %vm71_vm0, %v2351_v49 }
 0x532   :  { %1387 = vmatpush.msra.mxu1 %v1122_v15  ;;  %1038 = vmatpush.msra.mxu2 %v587_v16  ;;  %v1152_v15 = vld [vmem:[%s3320_s15 + $0x250] sm:$0xff]  ;;  %v1185_v16 = vld [vmem:[%s3320_s15 + $0x358] sm:$0xff] }
 0x533   :  { %1341 = vmatpush.msra.mxu3 %v1090_v17  ;;  %1370 = vmatpush.msrb.mxu0 %v1100_v29  ;;  %v1168_v17 = vld [vmem:[%s3320_s15 + $0x2d0] sm:$0xff]  ;;  %v1129_v29 = vld [vmem:[%s3320_s15 + $0x198] sm:$0xff] }
 0x534   :  { %1388 = vmatpush.msra.mxu1 %v1121_v19  ;;  %v1151_v19 = vld [vmem:[%s3320_s15 + $0x248] sm:$0xff] }
 0x535   :  { %1342 = vmatpush.msra.mxu3 %v1089_v20  ;;  %1371 = vmatpush.msrb.mxu0 %v1099_v33  ;;  %v1184_v20 = vld [vmem:[%s3320_s15 + $0x350] sm:$0xff] }
 0x536   :  { %1389 = vmatpush.msra.mxu1 %v1120_v22  ;;  %v1131_v22 = vld [vmem:[%s3320_s15 + $0x1a8] sm:$0xff]  ;;  %v1128_v33 = vld [vmem:[%s3320_s15 + $0x190] sm:$0xff] }
 0x537   :  { %1343 = vmatpush.msra.mxu3 %v1088_v23  ;;  %1372 = vmatpush.msrb.mxu0 %v1098_v39  ;;  %v1150_v23 = vld [vmem:[%s3320_s15 + $0x240] sm:$0xff] }
 0x538   :  { %1830 = vmatmul.msk.f32.vlgmr.msrb.gmra.mxu2 %vm71_vm0, %v2266_v13  ;;  %1832 = vmatmul.msk.f32.vlgmr.msrb.gmra.mxu3 %vm71_vm0, %v2266_v13  ;;  %v1126_v39 = vld [vmem:[%s3320_s15 + $0x180] sm:$0xff] }
 0x539   :  { %1836 = vmatmul.msk.f32.vlgmr.msrb.gmra.mxu1 %vm71_vm0, %v2266_v13  ;;  %1344 = vmatpush.msra.mxu3 %v1087_v24  ;;  %v1166_v24 = vld [vmem:[%s3320_s15 + $0x2c0] sm:$0xff] }
 0x53a   :  { %1390 = vmatpush.msra.mxu1 %v1119_v25  ;;  %1407 = vmatpush.msrb.mxu2 %v1141_v31  ;;  %v1130_v25 = vld [vmem:[%s3320_s15 + $0x1a0] sm:$0xff]  ;;  %v1181_v31 = vld [vmem:[%s3320_s15 + $0x338] sm:$0xff] }
 0x53b   :  { %1345 = vmatpush.msra.mxu3 %v1086_v27  ;;  %1373 = vmatpush.msrb.mxu0 %v1097_v43  ;;  %v1182_v27 = vld [vmem:[%s3320_s15 + $0x340] sm:$0xff]  ;;  %v1205_v43 = vld [vmem:[%s3320_s15 + $0x3f8] sm:$0xff] }
 0x53c   :  { %1391 = vmatpush.msra.mxu1 %v1118_v28  ;;  %1408 = vmatpush.msrb.mxu2 %v1140_v34  ;;  %v1165_v28 = vld [vmem:[%s3320_s15 + $0x2b8] sm:$0xff]  ;;  %v1147_v34 = vld [vmem:[%s3320_s15 + $0x228] sm:$0xff] }
 0x53d   :  { %1346 = vmatpush.msra.mxu3 %v1085_v30  ;;  %1374 = vmatpush.msrb.mxu0 %v1096_v47  ;;  %v1148_v30 = vld [vmem:[%s3320_s15 + $0x230] sm:$0xff] }
 0x53e   :  { %1392 = vmatpush.msra.mxu1 %v1117_v32  ;;  %1409 = vmatpush.msrb.mxu2 %v1139_v36  ;;  %v1164_v32 = vld [vmem:[%s3320_s15 + $0x2b0] sm:$0xff]  ;;  %v1163_v36 = vld [vmem:[%s3320_s15 + $0x2a8] sm:$0xff] }
 0x53f   :  { %1347 = vmatpush.msra.mxu3 %v1084_v35  ;;  %1375 = vmatpush.msrb.mxu0 %v1095_v52  ;;  %v1180_v35 = vld [vmem:[%s3320_s15 + $0x330] sm:$0xff] }
 0x540   :  { %1831 = vmatmul.msk.f32.gmra.mxu2 %vm71_vm0, %v2351_v49  ;;  %1833 = vmatmul.msk.f32.gmra.mxu3 %vm71_vm0, %v2351_v49  ;;  %v1204_v47 = vld [vmem:[%s3320_s15 + $0x3f0] sm:$0xff] }
 0x541   :  { %1837 = vmatmul.msk.f32.gmra.mxu1 %vm71_vm0, %v2351_v49  ;;  %1348 = vmatpush.msra.mxu3 %v1083_v37  ;;  %v1127_v37 = vld [vmem:[%s3320_s15 + $0x188] sm:$0xff]  ;;  %v1176_v52 = vld [vmem:[%s3320_s15 + $0x310] sm:$0xff] }
 0x542   :  { %1393 = vmatpush.msra.mxu1 %v1116_v38  ;;  %1410 = vmatpush.msrb.mxu2 %v1138_v41  ;;  %v1146_v38 = vld [vmem:[%s3320_s15 + $0x220] sm:$0xff] }
 0x543   :  { %1349 = vmatpush.msra.mxu3 %v1082_v40  ;;  %1376 = vmatpush.msrb.mxu0 %v1094_v57  ;;  %v1179_v40 = vld [vmem:[%s3320_s15 + $0x328] sm:$0xff]  ;;  %v1162_v41 = vld [vmem:[%s3320_s15 + $0x2a0] sm:$0xff] }
 0x544   :  { %1394 = vmatpush.msra.mxu1 %v1115_v42  ;;  %1411 = vmatpush.msrb.mxu2 %v1137_v45  ;;  %v1145_v42 = vld [vmem:[%s3320_s15 + $0x218] sm:$0xff]  ;;  %v1175_v57 = vld [vmem:[%s3320_s15 + $0x308] sm:$0xff] }
 0x545   :  { %1350 = vmatpush.msra.mxu3 %v1081_v44  ;;  %1453 = vmatpush.msra.mxu0 %v1173_v61  ;;  %v1178_v44 = vld [vmem:[%s3320_s15 + $0x320] sm:$0xff]  ;;  %v1161_v45 = vld [vmem:[%s3320_s15 + $0x298] sm:$0xff] }
 0x546   :  { %1395 = vmatpush.msra.mxu1 %v1114_v46  ;;  %1412 = vmatpush.msrb.mxu2 %v1136_v26  ;;  %v1144_v46 = vld [vmem:[%s3320_s15 + $0x210] sm:$0xff]  ;;  %v1174_v61 = vld [vmem:[%s3320_s15 + $0x300] sm:$0xff] }
 0x547   :  { %1351 = vmatpush.msra.mxu3 %v1080_v48  ;;  %1454 = vmatpush.msra.mxu0 %v1172_v3  ;;  %v1177_v48 = vld [vmem:[%s3320_s15 + $0x318] sm:$0xff]  ;;  %v1160_v26 = vld [vmem:[%s3320_s15 + $0x290] sm:$0xff] }
 0x548   :  { %1838 = vmatmul.msk.f32.vlgmr.msra.gmra.mxu2 %vm71_vm0, %v2266_v13  ;;  %1396 = vmatpush.msra.mxu1 %v1113_v50  ;;  %v1143_v50 = vld [vmem:[%s3320_s15 + $0x208] sm:$0xff] }
 0x549   :  { %1352 = vmatpush.msra.mxu3 %v1079_v51  ;;  %1413 = vmatpush.msrb.mxu2 %v1135_v54  ;;  %v1203_v51 = vld [vmem:[%s3320_s15 + $0x3e8] sm:$0xff]  ;;  %v1142_v54 = vld [vmem:[%s3320_s15 + $0x200] sm:$0xff] }
 0x54a   :  { %1397 = vmatpush.msra.mxu1 %v1112_v53  ;;  %1455 = vmatpush.msra.mxu0 %v1171_v6  ;;  %v1159_v53 = vld [vmem:[%s3320_s15 + $0x288] sm:$0xff] }
 0x54b   :  { %1353 = vmatpush.msra.mxu3 %v1078_v56  ;;  %1414 = vmatpush.msrb.mxu2 %v1134_v62  ;;  %v1202_v56 = vld [vmem:[%s3320_s15 + $0x3e0] sm:$0xff]  ;;  %v1200_v62 = vld [vmem:[%s3320_s15 + $0x3d0] sm:$0xff] }
 0x54c   :  { %1398 = vmatpush.msra.mxu1 %v1111_v58  ;;  %1456 = vmatpush.msra.mxu0 %v1170_v11  ;;  %v1158_v58 = vld [vmem:[%s3320_s15 + $0x280] sm:$0xff] }
 0x54d   :  { %1430 = vmatpush.msrb.mxu3 %v1157_v59  ;;  %1415 = vmatpush.msrb.mxu2 %v1133_v8  ;;  %v1201_v59 = vld [vmem:[%s3320_s15 + $0x3d8] sm:$0xff]  ;;  %v1195_v8 = vld [vmem:[%s3320_s15 + $0x3a8] sm:$0xff] }
 0x54e   :  { %1399 = vmatpush.msra.mxu1 %v1110_v63  ;;  %1457 = vmatpush.msra.mxu0 %v1169_v14  ;;  %v1199_v63 = vld [vmem:[%s3320_s15 + $0x3c8] sm:$0xff]  ;;  %v1194_v14 = vld [vmem:[%s3320_s15 + $0x3a0] sm:$0xff] }
 0x54f   :  { %1431 = vmatpush.msrb.mxu3 %v1156_v0  ;;  %1416 = vmatpush.msrb.mxu2 %v1132_v18  ;;  %v2817_v0 = vld [vmem:[%s3319_s14] sm:$0xff]  ;;  %v1193_v18 = vld [vmem:[%s3320_s15 + $0x398] sm:$0xff] }
 0x550   :  { %1476 = vmatpush.msrb.mxu1 %v1189_v1  ;;  %1839 = vmatmul.msk.f32.gmra.mxu2 %vm71_vm0, %v2351_v49  ;;  %v1198_v1 = vld [vmem:[%s3320_s15 + $0x3c0] sm:$0xff]  ;;  %v642_v3 = vperm.slane %v2817_v0, 2  ;;  %v641_v11 = vperm.slane %v2817_v0, 1 }
 0x551   :  { %1432 = vmatpush.msrb.mxu3 %v1155_v2  ;;  %1458 = vmatpush.msra.mxu0 %v1168_v17  ;;  %v1197_v2 = vld [vmem:[%s3320_s15 + $0x3b8] sm:$0xff]  ;;  %v1252_v17 = vld [vmem:[%s3320_s15 + $0x570] sm:$0xff] }
 0x552   :  { %1477 = vmatpush.msrb.mxu1 %v1188_v5  ;;  %1417 = vmatpush.msrb.mxu2 %v1131_v22  ;;  %v1196_v5 = vld [vmem:[%s3320_s15 + $0x3b0] sm:$0xff] }
 0x553   :  { %1433 = vmatpush.msrb.mxu3 %v1154_v7  ;;  %1459 = vmatpush.msra.mxu0 %v1167_v21 }
 0x554   :  { %1478 = vmatpush.msrb.mxu1 %v1187_v9  ;;  %1418 = vmatpush.msrb.mxu2 %v1130_v25  ;;  %v640_v9 = vperm.slane %v2817_v0, 0  ;;  %v1192_v25 = vld [vmem:[%s3320_s15 + $0x390] sm:$0xff] }
 0x555   :  { %1434 = vmatpush.msrb.mxu3 %v1153_v4  ;;  %1460 = vmatpush.msra.mxu0 %v1166_v24  ;;  %v1237_v24 = vld [vmem:[%s3320_s15 + $0x4f8] sm:$0xff] }
 0x556   :  { %1479 = vmatpush.msrb.mxu1 %v1186_v12  ;;  %1419 = vmatpush.msrb.mxu2 %v1129_v29  ;;  %v1253_v12 = vld [vmem:[%s3320_s15 + $0x578] sm:$0xff]  ;;  %v1191_v29 = vld [vmem:[%s3320_s15 + $0x388] sm:$0xff] }
 0x557   :  { %1435 = vmatpush.msrb.mxu3 %v1152_v15  ;;  %1461 = vmatpush.msra.mxu0 %v1165_v28  ;;  %v1236_v28 = vld [vmem:[%s3320_s15 + $0x4f0] sm:$0xff] }
 0x558   :  { %1480 = vmatpush.msrb.mxu1 %v1185_v16  ;;  %1420 = vmatpush.msrb.mxu2 %v1128_v33  ;;  %v1190_v33 = vld [vmem:[%s3320_s15 + $0x380] sm:$0xff] }
 0x559   :  { %1436 = vmatpush.msrb.mxu3 %v1151_v19  ;;  %1462 = vmatpush.msra.mxu0 %v1164_v32  ;;  %v1235_v32 = vld [vmem:[%s3320_s15 + $0x4e8] sm:$0xff] }
 0x55a   :  { %1481 = vmatpush.msrb.mxu1 %v1184_v20  ;;  %1421 = vmatpush.msrb.mxu2 %v1127_v37  ;;  %v1247_v37 = vld [vmem:[%s3320_s15 + $0x548] sm:$0xff] }
 0x55b   :  { %1437 = vmatpush.msrb.mxu3 %v1150_v23  ;;  %1463 = vmatpush.msra.mxu0 %v1163_v36  ;;  %v1251_v23 = vld [vmem:[%s3320_s15 + $0x568] sm:$0xff]  ;;  %v1234_v36 = vld [vmem:[%s3320_s15 + $0x4e0] sm:$0xff] }
 0x55c   :  { %1482 = vmatpush.msrb.mxu1 %v1183_v55  ;;  %1422 = vmatpush.msrb.mxu2 %v1126_v39  ;;  %v1221_v55 = vld [vmem:[%s3320_s15 + $0x478] sm:$0xff] }
 0x55d   :  { %1438 = vmatpush.msrb.mxu3 %v1149_v60  ;;  %1464 = vmatpush.msra.mxu0 %v1162_v41  ;;  %v1250_v60 = vld [vmem:[%s3320_s15 + $0x560] sm:$0xff]  ;;  %v1233_v39 = vld [vmem:[%s3320_s15 + $0x4d8] sm:$0xff]  ;;  %v1216_v41 = vld [vmem:[%s3320_s15 + $0x450] sm:$0xff] }
 0x55e   :  { %1483 = vmatpush.msrb.mxu1 %v1182_v27  ;;  %1499 = vmatpush.msra.mxu2 %v1205_v43  ;;  %v1220_v27 = vld [vmem:[%s3320_s15 + $0x470] sm:$0xff]  ;;  %v1245_v43 = vld [vmem:[%s3320_s15 + $0x538] sm:$0xff] }
 0x55f   :  { %1439 = vmatpush.msrb.mxu3 %v1148_v30  ;;  %1465 = vmatpush.msra.mxu0 %v1161_v45  ;;  %v1249_v30 = vld [vmem:[%s3320_s15 + $0x558] sm:$0xff]  ;;  %v1231_v45 = vld [vmem:[%s3320_s15 + $0x4c8] sm:$0xff] }
 0x560   :  { %1484 = vmatpush.msrb.mxu1 %v1181_v31  ;;  %1500 = vmatpush.msra.mxu2 %v1204_v47  ;;  %v1219_v31 = vld [vmem:[%s3320_s15 + $0x468] sm:$0xff]  ;;  %v1214_v47 = vld [vmem:[%s3320_s15 + $0x440] sm:$0xff] }
 0x561   :  { %1440 = vmatpush.msrb.mxu3 %v1147_v34  ;;  %1466 = vmatpush.msra.mxu0 %v1160_v26  ;;  %v1248_v34 = vld [vmem:[%s3320_s15 + $0x550] sm:$0xff]  ;;  %v1243_v26 = vld [vmem:[%s3320_s15 + $0x528] sm:$0xff] }
 0x562   :  { %1485 = vmatpush.msrb.mxu1 %v1180_v35  ;;  %1501 = vmatpush.msra.mxu2 %v1203_v51  ;;  %v1218_v35 = vld [vmem:[%s3320_s15 + $0x460] sm:$0xff]  ;;  %v1229_v51 = vld [vmem:[%s3320_s15 + $0x4b8] sm:$0xff] }
 0x563   :  { %1441 = vmatpush.msrb.mxu3 %v1146_v38  ;;  %1467 = vmatpush.msra.mxu0 %v1159_v53  ;;  %v1217_v38 = vld [vmem:[%s3320_s15 + $0x458] sm:$0xff]  ;;  %v1242_v53 = vld [vmem:[%s3320_s15 + $0x520] sm:$0xff] }
 0x564   :  { %1486 = vmatpush.msrb.mxu1 %v1179_v40  ;;  %1502 = vmatpush.msra.mxu2 %v1202_v56  ;;  %v1246_v40 = vld [vmem:[%s3320_s15 + $0x540] sm:$0xff] }
 0x565   :  { %1442 = vmatpush.msrb.mxu3 %v1145_v42  ;;  %1468 = vmatpush.msra.mxu0 %v1158_v58  ;;  %v1232_v42 = vld [vmem:[%s3320_s15 + $0x4d0] sm:$0xff]  ;;  %v1211_v58 = vld [vmem:[%s3320_s15 + $0x428] sm:$0xff] }
 0x566   :  { %1487 = vmatpush.msrb.mxu1 %v1178_v44  ;;  %1503 = vmatpush.msra.mxu2 %v1201_v59  ;;  %v1215_v44 = vld [vmem:[%s3320_s15 + $0x448] sm:$0xff] }
 0x567   :  { %1443 = vmatpush.msrb.mxu3 %v1144_v46  ;;  %v1244_v46 = vld [vmem:[%s3320_s15 + $0x530] sm:$0xff] }
 0x568   :  { %1488 = vmatpush.msrb.mxu1 %v1177_v48  ;;  %1504 = vmatpush.msra.mxu2 %v1200_v62  ;;  %v1230_v48 = vld [vmem:[%s3320_s15 + $0x4c0] sm:$0xff]  ;;  %v1227_v62 = vld [vmem:[%s3320_s15 + $0x4a8] sm:$0xff] }
 0x569   :  { %1444 = vmatpush.msrb.mxu3 %v1143_v50  ;;  %v1213_v50 = vld [vmem:[%s3320_s15 + $0x438] sm:$0xff] }
 0x56a   :  { %1489 = vmatpush.msrb.mxu1 %v1176_v52  ;;  %1505 = vmatpush.msra.mxu2 %v1199_v63  ;;  %v1210_v63 = vld [vmem:[%s3320_s15 + $0x420] sm:$0xff] }
 0x56b   :  { %1445 = vmatpush.msrb.mxu3 %v1142_v54  ;;  %v1212_v54 = vld [vmem:[%s3320_s15 + $0x430] sm:$0xff] }
 0x56c   :  { %1490 = vmatpush.msrb.mxu1 %v1175_v57  ;;  %1506 = vmatpush.msra.mxu2 %v1198_v1  ;;  %v1228_v57 = vld [vmem:[%s3320_s15 + $0x4b0] sm:$0xff] }
 0x56e   :  { %1491 = vmatpush.msrb.mxu1 %v1174_v61  ;;  %1507 = vmatpush.msra.mxu2 %v1197_v2  ;;  %v1241_v61 = vld [vmem:[%s3320_s15 + $0x518] sm:$0xff]  ;;  %v646_v2 = vperm.slane %v2817_v0, 6 }
 0x570   :  { %1508 = vmatpush.msra.mxu2 %v1196_v5  ;;  %v1240_v5 = vld [vmem:[%s3320_s15 + $0x510] sm:$0xff] }
 0x572   :  { %1509 = vmatpush.msra.mxu2 %v1195_v8 }
 0x574   :  { %v741_v6 = vpop.f32.mrf.mxu1  ;;  %1510 = vmatpush.msra.mxu2 %v1194_v14 }
 0x575   :  { %v742_v7 = vadd.f32 %v741_v6, %v642_v3  ;;  %v1226_v6 = vld [vmem:[%s3320_s15 + $0x4a0] sm:$0xff] }
 0x576   :  { %1511 = vmatpush.msra.mxu2 %v1193_v18  ;;  %v1208_v18 = vld [vmem:[%s3320_s15 + $0x410] sm:$0xff] }
 0x577   :  { %v1048_v4 = vmax.f32 %v742_v7, 0.0 }
 0x578   :  { %1512 = vmatpush.msra.mxu2 %v1192_v25  ;;  %v1317_v25 = vld [vmem:[%s3320_s15 + $0x778] sm:$0xff] }
 0x579   :  { %1400 = vmatmul.f32.vlgmr.msra.gmra.mxu1 %v1048_v4  ;;  %v695_v15 = vpop.f32.mrf.mxu2  ;;  %v718_v16 = vpop.f32.mrf.mxu3  ;;  %v1209_v4 = vld [vmem:[%s3320_s15 + $0x418] sm:$0xff] }
 0x57a   :  { %v696_v19 = vadd.f32 %v695_v15, %v640_v9  ;;  %v719_v20 = vadd.f32 %v718_v16, %v641_v11  ;;  %1568 = vmatpush.msra.mxu1 %v1253_v12  ;;  %1513 = vmatpush.msra.mxu2 %v1191_v29  ;;  %v1239_v16 = vld [vmem:[%s3320_s15 + $0x508] sm:$0xff] }
 0x57c   :  { %v1046_v21 = vmax.f32 %v696_v19, 0.0  ;;  %v1047_v22 = vmax.f32 %v719_v20, 0.0  ;;  %1569 = vmatpush.msra.mxu1 %v1252_v17  ;;  %1514 = vmatpush.msra.mxu2 %v1190_v33  ;;  %v810_v19 = vpop.f32.mrf.mxu0  ;;  %v643_v20 = vperm.slane %v2817_v0, 3  ;;  %v1316_v33 = vld [vmem:[%s3320_s15 + $0x770] sm:$0xff] }
 0x57e   :  { %1354 = vmatmul.f32.vlgmr.msra.gmra.mxu3 %v1046_v21  ;;  %1377 = vmatmul.f32.vlgmr.msrb.gmra.mxu0 %v1047_v22  ;;  %v644_v21 = vperm.slane %v2817_v0, 4  ;;  %v1224_v22 = vld [vmem:[%s3320_s15 + $0x490] sm:$0xff] }
 0x57f   :  { %1570 = vmatpush.msra.mxu1 %v1251_v23  ;;  %1522 = vmatpush.msra.mxu3 %v1221_v55  ;;  %v1238_v55 = vld [vmem:[%s3320_s15 + $0x500] sm:$0xff] }
 0x580   :  { %1545 = vmatpush.msrb.mxu0 %v1237_v24  ;;  %v1207_v24 = vld [vmem:[%s3320_s15 + $0x408] sm:$0xff] }
 0x581   :  { %1571 = vmatpush.msra.mxu1 %v1250_v60  ;;  %1523 = vmatpush.msra.mxu3 %v1220_v27  ;;  %v1223_v60 = vld [vmem:[%s3320_s15 + $0x488] sm:$0xff] }
 0x582   :  { %1546 = vmatpush.msrb.mxu0 %v1236_v28 }
 0x583   :  { %1572 = vmatpush.msra.mxu1 %v1249_v30  ;;  %1524 = vmatpush.msra.mxu3 %v1219_v31  ;;  %v1206_v30 = vld [vmem:[%s3320_s15 + $0x400] sm:$0xff] }
 0x584   :  { %1547 = vmatpush.msrb.mxu0 %v1235_v32 }
 0x585   :  { %1573 = vmatpush.msra.mxu1 %v1248_v34  ;;  %1525 = vmatpush.msra.mxu3 %v1218_v35  ;;  %v1222_v34 = vld [vmem:[%s3320_s15 + $0x480] sm:$0xff] }
 0x586   :  { %1548 = vmatpush.msrb.mxu0 %v1234_v36 }
 0x587   :  { %1574 = vmatpush.msra.mxu1 %v1247_v37  ;;  %1526 = vmatpush.msra.mxu3 %v1217_v38  ;;  %v1315_v38 = vld [vmem:[%s3320_s15 + $0x768] sm:$0xff] }
 0x588   :  { %1549 = vmatpush.msrb.mxu0 %v1233_v39 }
 0x589   :  { %1575 = vmatpush.msra.mxu1 %v1246_v40  ;;  %1527 = vmatpush.msra.mxu3 %v1216_v41  ;;  %v1269_v41 = vld [vmem:[%s3320_s15 + $0x5f8] sm:$0xff] }
 0x58a   :  { %1550 = vmatpush.msrb.mxu0 %v1232_v42  ;;  %v1285_v42 = vld [vmem:[%s3320_s15 + $0x678] sm:$0xff] }
 0x58b   :  { %1576 = vmatpush.msra.mxu1 %v1245_v43  ;;  %1528 = vmatpush.msra.mxu3 %v1215_v44  ;;  %v1301_v44 = vld [vmem:[%s3320_s15 + $0x6f8] sm:$0xff] }
 0x58c   :  { %1551 = vmatpush.msrb.mxu0 %v1231_v45  ;;  %v1314_v45 = vld [vmem:[%s3320_s15 + $0x760] sm:$0xff] }
 0x58d   :  { %1577 = vmatpush.msra.mxu1 %v1244_v46  ;;  %1529 = vmatpush.msra.mxu3 %v1214_v47  ;;  %v1268_v47 = vld [vmem:[%s3320_s15 + $0x5f0] sm:$0xff] }
 0x58e   :  { %v744_v52 = vpop.f32.mrf.mxu1  ;;  %1552 = vmatpush.msrb.mxu0 %v1230_v48  ;;  %v813_v43 = vpop.f32.mrf.mxu0  ;;  %v3038_v48 = vld [vmem:[%s3319_s14 + $0x8] sm:$0xff] }
 0x58f   :  { %v745_v56 = vadd.f32 %v744_v52, %v642_v3  ;;  %1578 = vmatpush.msra.mxu1 %v1243_v26  ;;  %1530 = vmatpush.msra.mxu3 %v1213_v50  ;;  %v1284_v26 = vld [vmem:[%s3320_s15 + $0x670] sm:$0xff] }
 0x590   :  { %1553 = vmatpush.msrb.mxu0 %v1229_v51  ;;  %v1300_v50 = vld [vmem:[%s3320_s15 + $0x6f0] sm:$0xff] }
 0x591   :  { %v1064_v59 = vmax.f32 %v745_v56, 0.0  ;;  %1579 = vmatpush.msra.mxu1 %v1242_v53  ;;  %1531 = vmatpush.msra.mxu3 %v1212_v54  ;;  %v1313_v53 = vld [vmem:[%s3320_s15 + $0x758] sm:$0xff]  ;;  %v1267_v54 = vld [vmem:[%s3320_s15 + $0x5e8] sm:$0xff]  ;;  %v650_v56 = vperm.slane %v3038_v48, 2 }
 0x592   :  { %1554 = vmatpush.msrb.mxu0 %v1228_v57 }
 0x593   :  { %1403 = vmatmul.f32.gmra.mxu1 %v1064_v59  ;;  %v698_v1 = vpop.f32.mrf.mxu2  ;;  %v721_v3 = vpop.f32.mrf.mxu3  ;;  %1532 = vmatpush.msra.mxu3 %v1211_v58  ;;  %v1283_v59 = vld [vmem:[%s3320_s15 + $0x668] sm:$0xff] }
 0x594   :  { %v699_v7 = vadd.f32 %v698_v1, %v640_v9  ;;  %v722_v8 = vadd.f32 %v721_v3, %v641_v11  ;;  %1580 = vmatpush.msra.mxu1 %v1241_v61  ;;  %1555 = vmatpush.msrb.mxu0 %v1227_v62  ;;  %v1225_v9 = vld [vmem:[%s3320_s15 + $0x498] sm:$0xff]  ;;  %v645_v11 = vperm.slane %v2817_v0, 5  ;;  %v1299_v61 = vld [vmem:[%s3320_s15 + $0x6e8] sm:$0xff]  ;;  %v1266_v1 = vld [vmem:[%s3320_s15 + $0x5e0] sm:$0xff] }
 0x595   :  { %1533 = vmatpush.msra.mxu3 %v1210_v63  ;;  %v1312_v63 = vld [vmem:[%s3320_s15 + $0x750] sm:$0xff] }
 0x596   :  { %v1062_v12 = vmax.f32 %v699_v7, 0.0  ;;  %v1063_v14 = vmax.f32 %v722_v8, 0.0  ;;  %v833_v15 = vpop.f32.mrf.mxu1  ;;  %1581 = vmatpush.msra.mxu1 %v1240_v5  ;;  %1556 = vmatpush.msrb.mxu0 %v1226_v6  ;;  %v811_v27 = vadd.f32 %v810_v19, %v645_v11  ;;  %v814_v62 = vadd.f32 %v813_v43, %v645_v11  ;;  %v1282_v5 = vld [vmem:[%s3320_s15 + $0x660] sm:$0xff]  ;;  %v902_v11 = vpop.f32.mrf.mxu0  ;;  %v1277_v43 = vld [vmem:[%s3320_s15 + $0x638] sm:$0xff] }
 0x597   :  { %v834_v17 = vadd.f32 %v833_v15, %v646_v2  ;;  %1534 = vmatpush.msra.mxu3 %v1209_v4  ;;  %v1298_v6 = vld [vmem:[%s3320_s15 + $0x6e0] sm:$0xff]  ;;  %v1311_v4 = vld [vmem:[%s3320_s15 + $0x748] sm:$0xff]  ;;  %v1265_v15 = vld [vmem:[%s3320_s15 + $0x5d8] sm:$0xff] }
 0x598   :  { %1357 = vmatmul.f32.gmra.mxu3 %v1062_v12  ;;  %1380 = vmatmul.f32.gmra.mxu0 %v1063_v14  ;;  %v1051_v39 = vmax.f32 %v811_v27, 0.0  ;;  %v647_v12 = vperm.slane %v2817_v0, 7  ;;  %v1067_v14 = vmax.f32 %v814_v62, 0.0  ;;  %v1310_v19 = vld [vmem:[%s3320_s15 + $0x740] sm:$0xff]  ;;  %v1309_v27 = vld [vmem:[%s3320_s15 + $0x738] sm:$0xff]  ;;  %v1291_v62 = vld [vmem:[%s3320_s15 + $0x6a8] sm:$0xff] }
 0x599   :  { %v1052_v23 = vmax.f32 %v834_v17, 0.0  ;;  %1582 = vmatpush.msra.mxu1 %v1239_v16  ;;  %1557 = vmatpush.msrb.mxu0 %v1225_v9  ;;  %v1281_v16 = vld [vmem:[%s3320_s15 + $0x658] sm:$0xff]  ;;  %v648_v9 = vperm.slane %v3038_v48, 0 }
 0x59a   :  { %1535 = vmatpush.msra.mxu3 %v1208_v18  ;;  %v1297_v18 = vld [vmem:[%s3320_s15 + $0x6d8] sm:$0xff] }
 0x59b   :  { %1492 = vmatmul.f32.vlgmr.msrb.gmra.mxu1 %v1052_v23  ;;  %v764_v28 = vpop.f32.mrf.mxu2  ;;  %v787_v29 = vpop.f32.mrf.mxu3  ;;  %1558 = vmatpush.msrb.mxu0 %v1224_v22  ;;  %v1305_v0 = vld [vmem:[%s3320_s15 + $0x718] sm:$0xff] }
 0x59c   :  { %1583 = vmatpush.msra.mxu1 %v1238_v55  ;;  %v765_v31 = vadd.f32 %v764_v28, %v643_v20  ;;  %v788_v32 = vadd.f32 %v787_v29, %v644_v21  ;;  %1536 = vmatpush.msra.mxu3 %v1207_v24  ;;  %v1280_v24 = vld [vmem:[%s3320_s15 + $0x650] sm:$0xff]  ;;  %v1263_v28 = vld [vmem:[%s3320_s15 + $0x5c8] sm:$0xff] }
 0x59d   :  { %1559 = vmatpush.msrb.mxu0 %v1223_v60 }
 0x59e   :  { %1660 = vmatpush.msrb.mxu1 %v1317_v25  ;;  %v1049_v35 = vmax.f32 %v765_v31, 0.0  ;;  %v1050_v36 = vmax.f32 %v788_v32, 0.0  ;;  %v836_v37 = vpop.f32.mrf.mxu1  ;;  %1537 = vmatpush.msra.mxu3 %v1206_v30  ;;  %v1296_v25 = vld [vmem:[%s3320_s15 + $0x6d0] sm:$0xff]  ;;  %v1279_v30 = vld [vmem:[%s3320_s15 + $0x648] sm:$0xff] }
 0x59f   :  { %v837_v40 = vadd.f32 %v836_v37, %v646_v2  ;;  %1560 = vmatpush.msrb.mxu0 %v1222_v34  ;;  %v1295_v31 = vld [vmem:[%s3320_s15 + $0x6c8] sm:$0xff]  ;;  %v1262_v34 = vld [vmem:[%s3320_s15 + $0x5c0] sm:$0xff] }
 0x5a0   :  { %1661 = vmatpush.msrb.mxu1 %v1316_v33  ;;  %1423 = vmatmul.f32.vlgmr.msrb.gmra.mxu2 %v1049_v35  ;;  %v1308_v33 = vld [vmem:[%s3320_s15 + $0x730] sm:$0xff]  ;;  %v1278_v37 = vld [vmem:[%s3320_s15 + $0x640] sm:$0xff] }
 0x5a1   :  { %1446 = vmatmul.f32.vlgmr.msrb.gmra.mxu3 %v1050_v36  ;;  %v1068_v46 = vmax.f32 %v837_v40, 0.0  ;;  %1469 = vmatmul.f32.vlgmr.msra.gmra.mxu0 %v1051_v39  ;;  %v1307_v40 = vld [vmem:[%s3320_s15 + $0x728] sm:$0xff] }
 0x5a2   :  { %1662 = vmatpush.msrb.mxu1 %v1315_v38  ;;  %1591 = vmatpush.msrb.mxu2 %v1269_v41  ;;  %v1294_v38 = vld [vmem:[%s3320_s15 + $0x6c0] sm:$0xff] }
 0x5a3   :  { %1614 = vmatpush.msrb.mxu3 %v1285_v42  ;;  %1637 = vmatpush.msra.mxu0 %v1301_v44  ;;  %v767_v51 = vpop.f32.mrf.mxu2  ;;  %v790_v52 = vpop.f32.mrf.mxu3  ;;  %v1261_v42 = vld [vmem:[%s3320_s15 + $0x5b8] sm:$0xff] }
 0x5a4   :  { %1663 = vmatpush.msrb.mxu1 %v1314_v45  ;;  %1592 = vmatpush.msrb.mxu2 %v1268_v47  ;;  %v768_v57 = vadd.f32 %v767_v51, %v643_v20  ;;  %v791_v58 = vadd.f32 %v790_v52, %v644_v21  ;;  %v649_v20 = vperm.slane %v3038_v48, 1  ;;  %v1264_v21 = vld [vmem:[%s3320_s15 + $0x5d0] sm:$0xff] }
 0x5a5   :  { %1495 = vmatmul.f32.gmra.mxu1 %v1068_v46  ;;  %1615 = vmatpush.msrb.mxu3 %v1284_v26  ;;  %v905_v46 = vpop.f32.mrf.mxu0  ;;  %v1293_v26 = vld [vmem:[%s3320_s15 + $0x6b8] sm:$0xff]  ;;  %v1260_v51 = vld [vmem:[%s3320_s15 + $0x5b0] sm:$0xff] }
 0x5a6   :  { %1638 = vmatpush.msra.mxu0 %v1300_v50  ;;  %v1065_v3 = vmax.f32 %v768_v57, 0.0  ;;  %1664 = vmatpush.msrb.mxu1 %v1313_v53  ;;  %v925_v2 = vpop.f32.mrf.mxu1  ;;  %v1066_v7 = vmax.f32 %v791_v58, 0.0  ;;  %v903_v32 = vadd.f32 %v902_v11, %v649_v20  ;;  %v1306_v50 = vld [vmem:[%s3320_s15 + $0x720] sm:$0xff]  ;;  %v1276_v53 = vld [vmem:[%s3320_s15 + $0x630] sm:$0xff]  ;;  %v1273_v11 = vld [vmem:[%s3320_s15 + $0x618] sm:$0xff] }
 0x5a7   :  { %1593 = vmatpush.msrb.mxu2 %v1267_v54  ;;  %v926_v8 = vadd.f32 %v925_v2, %v650_v56  ;;  %1616 = vmatpush.msrb.mxu3 %v1283_v59  ;;  %v1292_v54 = vld [vmem:[%s3320_s15 + $0x6b0] sm:$0xff]  ;;  %v1259_v59 = vld [vmem:[%s3320_s15 + $0x5a8] sm:$0xff] }
 0x5a8   :  { %1639 = vmatpush.msra.mxu0 %v1299_v61  ;;  %1665 = vmatpush.msrb.mxu1 %v1312_v63  ;;  %v1055_v41 = vmax.f32 %v903_v32, 0.0  ;;  %v1275_v61 = vld [vmem:[%s3320_s15 + $0x628] sm:$0xff]  ;;  %v906_v63 = vadd.f32 %v905_v46, %v649_v20  ;;  %v1289_v20 = vld [vmem:[%s3320_s15 + $0x698] sm:$0xff] }
 0x5a9   :  { %1594 = vmatpush.msrb.mxu2 %v1266_v1  ;;  %1617 = vmatpush.msrb.mxu3 %v1282_v5  ;;  %v1056_v17 = vmax.f32 %v926_v8, 0.0  ;;  %v1304_v1 = vld [vmem:[%s3320_s15 + $0x710] sm:$0xff] }
 0x5aa   :  { %1640 = vmatpush.msra.mxu0 %v1298_v6  ;;  %1666 = vmatpush.msrb.mxu1 %v1311_v4  ;;  %v1274_v6 = vld [vmem:[%s3320_s15 + $0x620] sm:$0xff]  ;;  %v1303_v4 = vld [vmem:[%s3320_s15 + $0x708] sm:$0xff] }
 0x5ab   :  { %1426 = vmatmul.f32.gmra.mxu2 %v1065_v3  ;;  %1449 = vmatmul.f32.gmra.mxu3 %v1066_v7  ;;  %v856_v22 = vpop.f32.mrf.mxu2  ;;  %v879_v23 = vpop.f32.mrf.mxu3  ;;  %v1258_v3 = vld [vmem:[%s3320_s15 + $0x5a0] sm:$0xff] }
 0x5ac   :  { %1472 = vmatmul.f32.gmra.mxu0 %v1067_v14  ;;  %1595 = vmatpush.msrb.mxu2 %v1265_v15  ;;  %v857_v55 = vadd.f32 %v856_v22, %v647_v12  ;;  %v880_v60 = vadd.f32 %v879_v23, %v648_v9  ;;  %v1290_v7 = vld [vmem:[%s3320_s15 + $0x6a0] sm:$0xff]  ;;  %v652_v15 = vperm.slane %v3038_v48, 4  ;;  %v653_v22 = vperm.slane %v3038_v48, 5  ;;  %v1256_v23 = vld [vmem:[%s3320_s15 + $0x590] sm:$0xff] }
 0x5ad   :  { %1618 = vmatpush.msrb.mxu3 %v1281_v16  ;;  %1641 = vmatpush.msra.mxu0 %v1297_v18  ;;  %v1071_v16 = vmax.f32 %v906_v63, 0.0  ;;  %v994_v18 = vpop.f32.mrf.mxu0 }
 0x5ae   :  { %1667 = vmatpush.msrb.mxu1 %v1310_v19  ;;  %1596 = vmatpush.msrb.mxu2 %v1264_v21  ;;  %v928_v29 = vpop.f32.mrf.mxu1  ;;  %v1053_v35 = vmax.f32 %v857_v55, 0.0  ;;  %v1054_v39 = vmax.f32 %v880_v60, 0.0  ;;  %v1302_v21 = vld [vmem:[%s3320_s15 + $0x700] sm:$0xff]  ;;  %v1288_v60 = vld [vmem:[%s3320_s15 + $0x690] sm:$0xff]  ;;  %v995_v32 = vadd.f32 %v994_v18, %v653_v22 }
 0x5af   :  { %1584 = vmatmul.f32.vlgmr.msra.gmra.mxu1 %v1056_v17  ;;  %1619 = vmatpush.msrb.mxu3 %v1280_v24  ;;  %v929_v36 = vadd.f32 %v928_v29, %v650_v56  ;;  %v654_v56 = vperm.slane %v3038_v48, 6  ;;  %v651_v17 = vperm.slane %v3038_v48, 3  ;;  %v1856_v18 = vld [vmem:[%s3321_s16] ss:$0 sm:$0xff] }
 0x5b0   :  { %1642 = vmatpush.msra.mxu0 %v1296_v25  ;;  %1668 = vmatpush.msrb.mxu1 %v1309_v27  ;;  %v1272_v25 = vld [vmem:[%s3320_s15 + $0x610] sm:$0xff] }
 0x5b1   :  { %1597 = vmatpush.msrb.mxu2 %v1263_v28  ;;  %1620 = vmatpush.msrb.mxu3 %v1279_v30  ;;  %v1072_v47 = vmax.f32 %v929_v36, 0.0  ;;  %v1255_v28 = vld [vmem:[%s3320_s15 + $0x588] sm:$0xff]  ;;  %v1286_v36 = vld [vmem:[%s3320_s15 + $0x680] sm:$0xff] }
 0x5b2   :  { %1643 = vmatpush.msra.mxu0 %v1295_v31  ;;  %1669 = vmatpush.msrb.mxu1 %v1308_v33  ;;  %v1271_v30 = vld [vmem:[%s3320_s15 + $0x608] sm:$0xff]  ;;  %v1254_v33 = vld [vmem:[%s3320_s15 + $0x580] sm:$0xff] }
 0x5b3   :  { %1598 = vmatpush.msrb.mxu2 %v1262_v34  ;;  %1621 = vmatpush.msrb.mxu3 %v1278_v37  ;;  %v859_v44 = vpop.f32.mrf.mxu2  ;;  %v882_v45 = vpop.f32.mrf.mxu3  ;;  %v1287_v31 = vld [vmem:[%s3320_s15 + $0x688] sm:$0xff] }
 0x5b4   :  { %1644 = vmatpush.msra.mxu0 %v1294_v38  ;;  %1670 = vmatpush.msrb.mxu1 %v1307_v40  ;;  %v860_v52 = vadd.f32 %v859_v44, %v647_v12  ;;  %v883_v58 = vadd.f32 %v882_v45, %v648_v9  ;;  %v1257_v9 = vld [vmem:[%s3320_s15 + $0x598] sm:$0xff] }
 0x5b5   :  { %1515 = vmatmul.f32.vlgmr.msra.gmra.mxu2 %v1053_v35  ;;  %1538 = vmatmul.f32.vlgmr.msra.gmra.mxu3 %v1054_v39  ;;  %v1270_v35 = vld [vmem:[%s3320_s15 + $0x600] sm:$0xff]  ;;  %v1333_v38 = vld [vmem:[%s3320_s15 + $0x7f8] sm:$0xff]  ;;  %v997_v44 = vpop.f32.mrf.mxu0 }
 0x5b6   :  { %1561 = vmatmul.f32.vlgmr.msrb.gmra.mxu0 %v1055_v41  ;;  %1599 = vmatpush.msrb.mxu2 %v1261_v42  ;;  %v1017_v57 = vpop.f32.mrf.mxu1  ;;  %v1069_v2 = vmax.f32 %v860_v52, 0.0  ;;  %v1070_v8 = vmax.f32 %v883_v58, 0.0  ;;  %v1059_v42 = vmax.f32 %v995_v32, 0.0  ;;  %v1326_v58 = vld [vmem:[%s3320_s15 + $0x7c0] sm:$0xff] }
 0x5b7   :  { %1622 = vmatpush.msrb.mxu3 %v1277_v43  ;;  %1645 = vmatpush.msra.mxu0 %v1293_v26  ;;  %v1018_v5 = vadd.f32 %v1017_v57, %v654_v56  ;;  %v1332_v43 = vld [vmem:[%s3320_s15 + $0x7f0] sm:$0xff]  ;;  %v998_v26 = vadd.f32 %v997_v44, %v653_v22  ;;  %v1327_v57 = vld [vmem:[%s3320_s15 + $0x7c8] sm:$0xff] }
 0x5b8   :  { %1671 = vmatpush.msrb.mxu1 %v1306_v50  ;;  %1600 = vmatpush.msrb.mxu2 %v1260_v51  ;;  %v1330_v50 = vld [vmem:[%s3320_s15 + $0x7e0] sm:$0xff] }
 0x5b9   :  { %1587 = vmatmul.f32.gmra.mxu1 %v1072_v47  ;;  %1623 = vmatpush.msrb.mxu3 %v1276_v53  ;;  %v1060_v19 = vmax.f32 %v1018_v5, 0.0  ;;  %v1331_v47 = vld [vmem:[%s3320_s15 + $0x7e8] sm:$0xff]  ;;  %v1329_v53 = vld [vmem:[%s3320_s15 + $0x7d8] sm:$0xff] }
 0x5ba   :  { %1646 = vmatpush.msra.mxu0 %v1292_v54  ;;  %1672 = vmatpush.msrb.mxu1 %v1305_v0  ;;  %v1075_v54 = vmax.f32 %v998_v26, 0.0  ;;  %v1325_v0 = vld [vmem:[%s3320_s15 + $0x7b8] sm:$0xff] }
 0x5bb   :  { %1601 = vmatpush.msrb.mxu2 %v1259_v59  ;;  %1624 = vmatpush.msrb.mxu3 %v1275_v61  ;;  %v971_v12 = vpop.f32.mrf.mxu3  ;;  %v948_v14 = vpop.f32.mrf.mxu2  ;;  %v1324_v59 = vld [vmem:[%s3320_s15 + $0x7b0] sm:$0xff]  ;;  %v1323_v61 = vld [vmem:[%s3320_s15 + $0x7a8] sm:$0xff] }
 0x5bc   :  { %1647 = vmatpush.msra.mxu0 %v1291_v62  ;;  %1673 = vmatpush.msrb.mxu1 %v1304_v1  ;;  %v972_v24 = vadd.f32 %v971_v12, %v652_v15  ;;  %v949_v27 = vadd.f32 %v948_v14, %v651_v17  ;;  %v1322_v62 = vld [vmem:[%s3320_s15 + $0x7a0] sm:$0xff]  ;;  %v655_v1 = vperm.slane %v3038_v48, 7 }
 0x5bd   :  { %1602 = vmatpush.msrb.mxu2 %v1258_v3  ;;  %1625 = vmatpush.msrb.mxu3 %v1274_v6  ;;  %v1321_v3 = vld [vmem:[%s3320_s15 + $0x798] sm:$0xff]  ;;  %v1319_v6 = vld [vmem:[%s3320_s15 + $0x788] sm:$0xff]  ;;  %v1318_v48 = vld [vmem:[%s3320_s15 + $0x780] sm:$0xff] }
 0x5be   :  { %1648 = vmatpush.msra.mxu0 %v1290_v7  ;;  %1674 = vmatpush.msrb.mxu1 %v1303_v4  ;;  %v1020_v55 = vpop.f32.mrf.mxu1  ;;  %v1058_v34 = vmax.f32 %v972_v24, 0.0  ;;  %v1057_v37 = vmax.f32 %v949_v27, 0.0 }
 0x5bf   :  { %1518 = vmatmul.f32.gmra.mxu2 %v1069_v2  ;;  %1541 = vmatmul.f32.gmra.mxu3 %v1070_v8  ;;  %v1021_v29 = vadd.f32 %v1020_v55, %v654_v56  ;;  %v1328_v56 = vld [vmem:[%s3320_s15 + $0x7d0] sm:$0xff] }
 0x5c0   :  { %1564 = vmatmul.f32.gmra.mxu0 %v1071_v16  ;;  %1603 = vmatpush.msrb.mxu2 %v1257_v9  ;;  %v1320_v2 = vld [vmem:[%s3320_s15 + $0x790] sm:$0xff] }
 0x5c1   :  { %1626 = vmatpush.msrb.mxu3 %v1273_v11  ;;  %1649 = vmatpush.msra.mxu0 %v1289_v20  ;;  %v1076_v40 = vmax.f32 %v1021_v29, 0.0 }
 0x5c2   :  { %1675 = vmatpush.msrb.mxu1 %v1302_v21  ;;  %1604 = vmatpush.msrb.mxu2 %v1256_v23 }
 0x5c3   :  { %1676 = vmatmul.f32.vlgmr.msrb.gmra.mxu1 %v1060_v19  ;;  %1627 = vmatpush.msrb.mxu3 %v1272_v25  ;;  %v974_v39 = vpop.f32.mrf.mxu3  ;;  %v951_v41 = vpop.f32.mrf.mxu2 }
 0x5c4   :  { %1650 = vmatpush.msra.mxu0 %v1288_v60  ;;  %1605 = vmatpush.msrb.mxu2 %v1255_v28  ;;  %v975_v45 = vadd.f32 %v974_v39, %v652_v15  ;;  %v952_v46 = vadd.f32 %v951_v41, %v651_v17 }
 0x5c5   :  { %1628 = vmatpush.msrb.mxu3 %v1271_v30 }
 0x5c6   :  { %1651 = vmatpush.msra.mxu0 %v1287_v31  ;;  %1606 = vmatpush.msrb.mxu2 %v1254_v33  ;;  %v1074_v51 = vmax.f32 %v975_v45, 0.0  ;;  %v1073_v52 = vmax.f32 %v952_v46, 0.0 }
 0x5c7   :  { %1629 = vmatpush.msrb.mxu3 %v1270_v35  ;;  %1607 = vmatmul.f32.vlgmr.msrb.gmra.mxu2 %v1057_v37 }
 0x5c8   :  { %1652 = vmatpush.msra.mxu0 %v1286_v36  ;;  %1683 = vmatpush.msra.mxu2 %v1333_v38 }
 0x5c9   :  { %1630 = vmatmul.f32.vlgmr.msrb.gmra.mxu3 %v1058_v34  ;;  %1653 = vmatmul.f32.vlgmr.msra.gmra.mxu0 %v1059_v42 }
 0x5ca   :  { %1684 = vmatpush.msra.mxu2 %v1332_v43 }
 0x5cb   :  { %1679 = vmatmul.f32.gmra.mxu1 %v1076_v40  ;;  %v1040_v63 = vpop.f32.mrf.mxu2 }
 0x5cc   :  { %1685 = vmatpush.msra.mxu2 %v1331_v47  ;;  %v1041_v5 = vadd.f32 %v1040_v63, %v655_v1 }
 0x5ce   :  { %1686 = vmatpush.msra.mxu2 %v1330_v50  ;;  %v1061_v7 = vmax.f32 %v1041_v5, 0.0 }
 0x5cf   :  { %1610 = vmatmul.f32.gmra.mxu2 %v1073_v52 }
 0x5d0   :  { %1687 = vmatpush.msra.mxu2 %v1329_v53 }
 0x5d1   :  { %1633 = vmatmul.f32.gmra.mxu3 %v1074_v51  ;;  %1656 = vmatmul.f32.gmra.mxu0 %v1075_v54 }
 0x5d2   :  { %1688 = vmatpush.msra.mxu2 %v1328_v56 }
 0x5d3   :  { %v1043_v8 = vpop.f32.mrf.mxu2 }
 0x5d4   :  { %1689 = vmatpush.msra.mxu2 %v1327_v57  ;;  %v1044_v4 = vadd.f32 %v1043_v8, %v655_v1 }
 0x5d6   :  { %1690 = vmatpush.msra.mxu2 %v1326_v58  ;;  %v1077_v12 = vmax.f32 %v1044_v4, 0.0 }
 0x5d8   :  { %1691 = vmatpush.msra.mxu2 %v1325_v0 }
 0x5da   :  { %1692 = vmatpush.msra.mxu2 %v1324_v59 }
 0x5dc   :  { %1693 = vmatpush.msra.mxu2 %v1323_v61 }
 0x5de   :  { %1694 = vmatpush.msra.mxu2 %v1322_v62 }
 0x5e0   :  { %1695 = vmatpush.msra.mxu2 %v1321_v3 }
 0x5e2   :  { %1696 = vmatpush.msra.mxu2 %v1320_v2 }
 0x5e4   :  { %1697 = vmatpush.msra.mxu2 %v1319_v6 }
 0x5e6   :  { %1698 = vmatpush.msra.mxu2 %v1318_v48 }
 0x5e7   :  { %1699 = vmatmul.f32.vlgmr.msra.gmra.mxu2 %v1061_v7 }
 0x5ef   :  { %1702 = vmatmul.f32.gmra.mxu2 %v1077_v12 }
 0x5f6   :  { %v1401_v16 = vpop.f32.mrf.mxu1 }
 0x5fb   :  { %v1378_v15 = vpop.f32.mrf.mxu0 }
 0x601   :  { %v1355_v14 = vpop.f32.mrf.mxu3 }
 0x602   :  { %v1356_v21 = vadd.f32 %v1856_v18, %v1355_v14 }
 0x604   :  { %v1379_v55 = vadd.f32 %v1378_v15, %v1356_v21 }
 0x606   :  { %v1402_v60 = vadd.f32 %v1401_v16, %v1379_v55 }
 0x610   :  { %v1404_v19 = vpop.f32.mrf.mxu1 }
 0x615   :  { %v1381_v11 = vpop.f32.mrf.mxu0 }
 0x618   :  { %v1493_v24 = vpop.f32.mrf.mxu1 }
 0x61b   :  { %v1358_v9 = vpop.f32.mrf.mxu3 }
 0x61c   :  { %v1359_v25 = vadd.f32 %v1856_v18, %v1358_v9 }
 0x61e   :  { %v1470_v22 = vpop.f32.mrf.mxu0  ;;  %v1382_v29 = vadd.f32 %v1381_v11, %v1359_v25 }
 0x620   :  { %v1405_v33 = vadd.f32 %v1404_v19, %v1382_v29 }
 0x622   :  { %v1496_v34 = vpop.f32.mrf.mxu1 }
 0x623   :  { %v1424_v17 = vpop.f32.mrf.mxu2 }
 0x624   :  { %v1447_v20 = vpop.f32.mrf.mxu3  ;;  %v1425_v28 = vadd.f32 %v1424_v17, %v1402_v60 }
 0x626   :  { %v1448_v32 = vadd.f32 %v1447_v20, %v1425_v28 }
 0x628   :  { %v1471_v35 = vadd.f32 %v1470_v22, %v1448_v32 }
 0x629   :  { %v1473_v30 = vpop.f32.mrf.mxu0 }
 0x62a   :  { %v1494_v39 = vadd.f32 %v1493_v24, %v1471_v35 }
 0x62c   :  { %v1585_v44 = vpop.f32.mrf.mxu1 }
 0x62e   :  { %v1427_v23 = vpop.f32.mrf.mxu2  ;;  %v1450_v27 = vpop.f32.mrf.mxu3 }
 0x62f   :  { %v1428_v36 = vadd.f32 %v1427_v23, %v1405_v33 }
 0x631   :  { %v1451_v38 = vadd.f32 %v1450_v27, %v1428_v36 }
 0x633   :  { %v1562_v40 = vpop.f32.mrf.mxu0  ;;  %v1474_v43 = vadd.f32 %v1473_v30, %v1451_v38 }
 0x635   :  { %v1497_v47 = vadd.f32 %v1496_v34, %v1474_v43 }
 0x636   :  { %v1588_v56 = vpop.f32.mrf.mxu1 }
 0x638   :  { %v1516_v31 = vpop.f32.mrf.mxu2  ;;  %v1539_v37 = vpop.f32.mrf.mxu3 }
 0x639   :  { %v1517_v42 = vadd.f32 %v1516_v31, %v1494_v39 }
 0x63b   :  { %v1540_v45 = vadd.f32 %v1539_v37, %v1517_v42 }
 0x63d   :  { %v1563_v26 = vadd.f32 %v1562_v40, %v1540_v45  ;;  %v1565_v51 = vpop.f32.mrf.mxu0 }
 0x63f   :  { %v1586_v54 = vadd.f32 %v1585_v44, %v1563_v26 }
 0x640   :  { %v1677_v2 = vpop.f32.mrf.mxu1 }
 0x642   :  { %v1519_v41 = vpop.f32.mrf.mxu2  ;;  %v1542_v46 = vpop.f32.mrf.mxu3 }
 0x643   :  { %v1520_v50 = vadd.f32 %v1519_v41, %v1497_v47 }
 0x645   :  { %v1543_v53 = vadd.f32 %v1542_v46, %v1520_v50 }
 0x646   :  { %v1654_v61 = vpop.f32.mrf.mxu0 }
 0x647   :  { %v1566_v0 = vadd.f32 %v1565_v51, %v1543_v53 }
 0x648   :  { %v1680_v16 = vpop.f32.mrf.mxu1 }
 0x649   :  { %v1589_v63 = vadd.f32 %v1588_v56, %v1566_v0 }
 0x64a   :  { %v1608_v52 = vpop.f32.mrf.mxu2 }
 0x64b   :  { %v1609_v57 = vadd.f32 %v1608_v52, %v1586_v54  ;;  %v1857_v52 = vld [vmem:[%s3324_s19] ss:$0 sm:$0xff]  ;;  %s1778_s19 = sshll.u32 %s3326_s21, 4  ;;  %s1779_s19 = int_to_ptr.hbm [resolvable:$true] %s1778_s19 }
 0x64c   :  { %v1631_v58 = vpop.f32.mrf.mxu3 }
 0x64d   :  { %v1632_v59 = vadd.f32 %v1631_v58, %v1609_v57  ;;  %v1858_v57 = vld [vmem:[%s3325_s20] ss:$0 sm:$0xff]  ;;  %s1910_s20 = smov 128  }
 0x64e   :  { %v1657_v4 = vpop.f32.mrf.mxu0 }
 0x64f   :  { %v1655_v1 = vadd.f32 %v1654_v61, %v1632_v59 }
 0x651   :  { %v1678_v48 = vadd.f32 %v1677_v2, %v1655_v1 }
 0x652   :  { %v1611_v62 = vpop.f32.mrf.mxu2 }
 0x653   :  { %v1612_v3 = vadd.f32 %v1611_v62, %v1589_v63 }
 0x654   :  { %v1634_v5 = vpop.f32.mrf.mxu3 }
 0x655   :  { %v1635_v6 = vadd.f32 %v1634_v5, %v1612_v3 }
 0x657   :  { %v1658_v12 = vadd.f32 %v1657_v4, %v1635_v6 }
 0x659   :  { %v1681_v9 = vadd.f32 %v1680_v16, %v1658_v12 }
 0x66a   :  { %v1700_v7 = vpop.f32.mrf.mxu2 }
 0x66b   :  { %v1701_v8 = vadd.f32 %v1700_v7, %v1678_v48 }
 0x66d   :  { %v1706_v14 = vadd.f32 %v1701_v8, %v2266_v13 }
 0x66f   :  { %v1708_v15 = vsel %vm71_vm0, %v1706_v14, 0.0 }
 0x670   :  { %1709 = vadd.xlane.f32.xlu1 %v1708_v15 }
 0x672   :  { %v1703_v11 = vpop.f32.mrf.mxu2 }
 0x673   :  { %v1704_v17 = vadd.f32 %v1703_v11, %v1681_v9 }
 0x675   :  { %v1707_v18 = vadd.f32 %v1704_v17, %v2351_v49 }
 0x677   :  { %v1711_v19 = vsel %vm71_vm0, %v1707_v18, 0.0 }
 0x678   :  { %1712 = vadd.xlane.f32.xlu0 %v1711_v19 }
 0x6e3   :  { %v1710_v20 = vpop.xlane.xlu1 %1709 }
 0x6e4   :  { %v1714_v21 = vmul.f32 %v1710_v20, %v2030_v10 }
 0x6e6   :  { %v1716_v22 = vsub.f32 %v1706_v14, %v1714_v21 }
 0x6e8   :  { %v1718_v23 = vmul.f32 %v1716_v22, %v1716_v22 }
 0x6ea   :  { %v1720_v55 = vsel %vm71_vm0, %v1718_v23, 0.0 }
 0x6eb   :  { %v1713_v13 = vpop.xlane.xlu0 %1712  ;;  %1721 = vadd.xlane.f32.xlu1 %v1720_v55 }
 0x6ec   :  { %v1715_v24 = vmul.f32 %v1713_v13, %v2030_v10 }
 0x6ee   :  { %v1717_v25 = vsub.f32 %v1707_v18, %v1715_v24 }
 0x6f0   :  { %v1719_v60 = vmul.f32 %v1717_v25, %v1717_v25 }
 0x6f2   :  { %v1723_v27 = vsel %vm71_vm0, %v1719_v60, 0.0 }
 0x6f3   :  { %1724 = vadd.xlane.f32.xlu0 %v1723_v27 }
 0x75e   :  { %v1722_v49 = vpop.xlane.xlu1 %1721 }
 0x75f   :  { %v1726_v28 = vmul.f32 0.032258064, %v1722_v49 }
 0x761   :  { %1873 = vrsqrt.f32 %v1726_v28  ;;  %vm1735_vm2 = vcmp.eq.f32.partialorder %v1726_v28, inf  ;;  %v1738_v40 = vand.u32 2147483648, %v1726_v28  ;;  %vm1737_vm3 = vcmp.eq.f32.partialorder %v1726_v28, 0.0 }
 0x766   :  { %v1725_v29 = vpop.xlane.xlu0 %1724 }
 0x767   :  { %v1874_v30 = vpop.eup %1873  ;;  %v1727_v31 = vmul.f32 0.032258064, %v1725_v29 }
 0x768   :  { %v1729_v32 = vmul.f32 %v1874_v30, %v1726_v28 }
 0x769   :  { %1875 = vrsqrt.f32 %v1727_v31  ;;  %vm1747_vm4 = vcmp.eq.f32.partialorder %v1727_v31, inf  ;;  %v1750_v26 = vand.u32 2147483648, %v1727_v31  ;;  %vm1749_vm5 = vcmp.eq.f32.partialorder %v1727_v31, 0.0 }
 0x76a   :  { %v1730_v33 = vmul.f32 %v1874_v30, %v1729_v32 }
 0x76c   :  { %v1731_v34 = vmul.f32 0.5, %v1730_v33 }
 0x76e   :  { %v1732_v35 = vsub.f32 1.5, %v1731_v34 }
 0x76f   :  { %v1876_v36 = vpop.eup %1875 }
 0x770   :  { %v1733_v37 = vmul.f32 %v1874_v30, %v1732_v35  ;;  %v1741_v38 = vmul.f32 %v1876_v36, %v1727_v31 }
 0x772   :  { %v1734_v10 = vmul.f32 %v1733_v37, %v1726_v28  ;;  %v1742_v39 = vmul.f32 %v1876_v36, %v1741_v38 }
 0x774   :  { %v1736_v41 = vsel %vm1735_vm2, %v1726_v28, %v1734_v10  ;;  %v1743_v42 = vmul.f32 0.5, %v1742_v39 }
 0x775   :  { %v1739_v43 = vsel %vm1737_vm3, %v1738_v40, %v1736_v41 }
 0x776   :  { %v1744_v44 = vsub.f32 1.5, %v1743_v42  ;;  %v1752_v45 = vadd.f32 1e-06, %v1739_v43 }
 0x778   :  { %v1745_v46 = vmul.f32 %v1876_v36, %v1744_v44  ;;  %1877 = vrcp.f32 %v1752_v45 }
 0x77a   :  { %v1746_v47 = vmul.f32 %v1745_v46, %v1727_v31 }
 0x77c   :  { %v1748_v50 = vsel %vm1747_vm4, %v1727_v31, %v1746_v47 }
 0x77d   :  { %v1751_v51 = vsel %vm1749_vm5, %v1750_v26, %v1748_v50 }
 0x77e   :  { %v1878_v53 = vpop.eup %1877  ;;  %v1753_v54 = vadd.f32 1e-06, %v1751_v51 }
 0x77f   :  { %v1757_v56 = vmul.f32 %v1878_v53, %v1716_v22 }
 0x780   :  { %1879 = vrcp.f32 %v1753_v54 }
 0x781   :  { %v1762_v58 = vmul.f32 %v1857_v52, %v1757_v56 }
 0x783   :  { %v1768_v0 = vadd.f32 %v1858_v57, %v1762_v58 }
 0x785   :  { %1770 = vst.msk [vmem:[#allocation2] sm:$0xff] %vm71_vm0, %v1768_v0 }
 0x786   :  { %v1880_v59 = vpop.eup %1879 }
 0x787   :  { %v1758_v61 = vmul.f32 %v1880_v59, %v1717_v25 }
 0x789   :  { %v1763_v62 = vmul.f32 %v1857_v52, %v1758_v61 }
 0x78b   :  { %v1769_v63 = vadd.f32 %v1858_v57, %v1763_v62 }
 0x78d   :  { %1771 = vst.msk [vmem:[#allocation2 + $0x8] sm:$0xff] %vm71_vm0, %v1769_v63 }
 0x78e   :  { %1784 = dma.vmem_to_hbm [thread:$0]  %s1777_s7, 256, %s1779_s19, [#allocation3], %s1910_s20, %s1910_s20, %s1911_s25  }
 0x78f   :  { %1905 = dma.done.wait [#allocation3], 256  }
 0x790   :  { %1906 = vsyncadd [#allocation3], 4294967040 }
 0x791   :  { %1789 = vsyncpa [#allocation3], 1 }

</bundles_post_ra>
